<compile_context>
chip_gen: v7x
topology: tpu7x:2x2x1
jax: 0.10.0
libtpu: 0.0.40
codegen_flags: <defaults>
</compile_context>

<pallas_src>
from functools import partial

import numpy as np
import jax
import jax.numpy as jnp
from jax import lax
from jax.experimental import pallas as pl
from jax.experimental.pallas import tpu as pltpu

_DOT_PREC = lax.Precision.HIGHEST  # exact f32 contractions (matches reference)


def _local_kernel(x_ref, bias_ref, edge_ref, wc1_ref, wc2_ref, w1f_ref, w2_ref,
                  sc_ref, sh_ref, o_ref, *, n_limbs, cover_all):
    x = x_ref[0]                              # (C, VK, L) f32, L = Nb*20

    # ---- per-limb masked max pool: additive 0/-inf bias, no select pass ----
    acc = None
    lmax = None
    for l in range(n_limbs):                  # static unroll, n_limbs = 5
        m = jnp.max(x + bias_ref[l], axis=1)  # (C, L); bias_ref[l]: (VK, 1)
        acc = m if acc is None else acc + m
        lmax = m if lmax is None else jnp.maximum(lmax, m)
    y2 = acc * jnp.float32(1.0 / n_limbs)     # AdaptiveAvgPool over limb maxes
    # Full-skeleton AdaptiveMaxPool2d((1,20)) == max of limb maxes when the
    # limbs cover every joint; otherwise fall back to a full scan.
    y1 = lmax if cover_all else jnp.max(x, axis=1)

    # ---- concat_conv (1x1, no bias) + concat_bn + ReLU : MXU GEMMs ----
    z = (jnp.dot(wc1_ref[...], y1, preferred_element_type=jnp.float32,
                 precision=_DOT_PREC) +
         jnp.dot(wc2_ref[...], y2, preferred_element_type=jnp.float32,
                 precision=_DOT_PREC))
    z = jnp.maximum(z * sc_ref[0] + sh_ref[0], 0.0)
    # TODO(synk): Dropout2d(0.2) is modeled in eval mode (identity).

    # ---- cnn1 (1x3, padding (0,1), no bias) + bn1 + ReLU : ONE fused GEMM ---
    dim2 = z.shape[0]
    mL = edge_ref[0:1, :]                     # (1, L): 0 where lane % 20 == 0
    mR = edge_ref[1:2, :]                     # (1, L): 0 where lane % 20 == 19
    zero_col = jnp.zeros((dim2, 1), jnp.float32)
    z_left = jnp.concatenate([zero_col, z[:, :-1]], axis=1) * mL   # z[w-1]
    z_right = jnp.concatenate([z[:, 1:], zero_col], axis=1) * mR   # z[w+1]
    z_stack = jnp.concatenate([z_left, z, z_right], axis=0)        # (3*dim2, L)
    z1 = jnp.dot(w1f_ref[...], z_stack, preferred_element_type=jnp.float32,
                 precision=_DOT_PREC)
    z1 = jnp.maximum(z1 * sc_ref[1] + sh_ref[1], 0.0)

    # ---- cnn2 (1x1, no bias) + bn2 + ReLU ----
    z2 = jnp.dot(w2_ref[...], z1, preferred_element_type=jnp.float32,
                 precision=_DOT_PREC)
    z2 = jnp.maximum(z2 * sc_ref[2] + sh_ref[2], 0.0)

    o_ref[0] = z2


def _pick_nb(n, c, vk, budget_bytes=8 << 20):
    """Largest divisor of n whose double-buffered f32 input block fits a small
    VMEM budget (safe for v7x's 64 MiB VMEM and default scoped limits)."""
    nb = 1
    for cand in range(1, n + 1):
        if n % cand:
            continue
        if 2 * c * vk * cand * 20 * 4 <= budget_bytes and cand * 20 <= 4096:
            nb = cand
    return nb


def local_forward(x, limb_blocks, params, block_batch=None):
    """x: (N, C=dim1, V, T) NCHW, T % 20 == 0. Returns (N, dim2, 1, 20)."""
    N, C, V, T = x.shape
    assert T % 20 == 0, "kernel assumes T is a multiple of 20 (exact adaptive pooling)"
    k = T // 20
    VK = V * k

    nb = block_batch if block_batch is not None else _pick_nb(N, C, VK)
    assert N % nb == 0
    G = N // nb
    L = nb * 20

    # Fold time sub-bins onto the joint (sublane) axis; put nb samples x 20
    # pooling bins on the lane axis.
    xr = (jnp.reshape(x, (G, nb, C, V, 20, k))
             .transpose(0, 2, 3, 5, 1, 4)          # (G, C, V, k, nb, 20)
             .reshape(G, C, VK, L))

    # Limb membership -> additive bias (0 on member rows, -inf elsewhere).
    la, ra, ll, rl, hs = limb_blocks
    order = (ll, rl, la, ra, hs)                   # multi_scale_spatial.forward order
    mask_np = np.zeros((len(order), V), np.float32)
    for i, idx in enumerate(order):
        mask_np[i, np.asarray(idx)] = 1.0
    cover_all = bool((mask_np.sum(axis=0) > 0).all())
    bias_np = np.where(mask_np > 0.5, 0.0, -np.inf).astype(np.float32)
    bias = jnp.asarray(np.repeat(bias_np, k, axis=1))[:, :, None]   # (5, VK, 1)

    # Edge masks for the 1x3 conv: zero taps that would cross a per-sample
    # boundary (reproduces per-sample zero padding in the flattened lane axis).
    w_idx = np.arange(L)
    edge = jnp.asarray(np.stack([(w_idx % 20 != 0), (w_idx % 20 != 19)],
                                axis=0).astype(np.float32))          # (2, L)

    wc, w1, w2 = params["wc"], params["w1"], params["w2"]
    dim2 = wc.shape[0]
    wc1, wc2 = wc[:, :C], wc[:, C:]                                  # split of cat(y1,y2)
    # Flatten the 3 conv taps into one (dim2, 3*dim2) weight for a single GEMM.
    w1f = jnp.concatenate([w1[:, :, 0], w1[:, :, 1], w1[:, :, 2]], axis=1)
    scales = params["scales"][:, :, None]                            # (3, dim2, 1)
    shifts = params["shifts"][:, :, None]

    kernel = partial(_local_kernel, n_limbs=bias.shape[0], cover_all=cover_all)

    out = pl.pallas_call(
        kernel,
        out_shape=jax.ShapeDtypeStruct((G, dim2, L), jnp.float32),
        grid_spec=pltpu.PrefetchScalarGridSpec(
            num_scalar_prefetch=0,
            grid=(G,),
            in_specs=[
                pl.BlockSpec((1, C, VK, L), lambda g: (g, 0, 0, 0)),
                pl.BlockSpec(bias.shape, lambda g: (0, 0, 0)),
                pl.BlockSpec(edge.shape, lambda g: (0, 0)),
                pl.BlockSpec(wc1.shape, lambda g: (0, 0)),
                pl.BlockSpec(wc2.shape, lambda g: (0, 0)),
                pl.BlockSpec(w1f.shape, lambda g: (0, 0)),
                pl.BlockSpec(w2.shape, lambda g: (0, 0)),
                pl.BlockSpec(scales.shape, lambda g: (0, 0, 0)),
                pl.BlockSpec(shifts.shape, lambda g: (0, 0, 0)),
            ],
            out_specs=pl.BlockSpec((1, dim2, L), lambda g: (g, 0, 0)),
        ),
        compiler_params=pltpu.CompilerParams(dimension_semantics=("parallel",)),
    )(xr, bias, edge, wc1, wc2, w1f, w2, scales, shifts)

    # (G, dim2, nb*20) -> (N, dim2, 1, 20)
    out = (out.reshape(G, dim2, nb, 20)
              .transpose(0, 2, 1, 3)
              .reshape(N, dim2, 1, 20))
    return out


def ref_forward(x, limb_blocks, params):
    """Pure-JAX reference of local.forward (eval mode)."""
    wc, w1, w2 = params["wc"], params["w1"], params["w2"]
    scales, shifts = params["scales"], params["shifts"]

    def amax_pool(v):  # AdaptiveMaxPool2d((1, 20)) for W % 20 == 0
        n, c, h, w = v.shape
        return jnp.max(v.reshape(n, c, h, 20, w // 20), axis=(2, 4))[:, :, None, :]

    la, ra, ll, rl, hs = limb_blocks
    y1 = amax_pool(x)
    pools = [amax_pool(x[:, :, np.asarray(idx), :]) for idx in (ll, rl, la, ra, hs)]
    y2 = jnp.mean(jnp.concatenate(pools, axis=2), axis=2, keepdims=True)
    y = jnp.concatenate([y1, y2], axis=1)                  # (N, 2*dim1, 1, 20)

    def conv1x1(v, w):
        return jnp.einsum("oc,nchw->nohw", w, v, precision=_DOT_PREC)

    def bn(v, i):
        return v * scales[i][None, :, None, None] + shifts[i][None, :, None, None]

    z = jnp.maximum(bn(conv1x1(y, wc), 0), 0.0)
    W = z.shape[-1]
    zp = jnp.pad(z, ((0, 0), (0, 0), (0, 0), (1, 1)))
    z1 = sum(jnp.einsum("oc,nchw->nohw", w1[:, :, dk], zp[..., dk:dk + W],
                        precision=_DOT_PREC) for dk in range(3))
    z1 = jnp.maximum(bn(z1, 1), 0.0)
    z2 = jnp.maximum(bn(conv1x1(z1, w2), 2), 0.0)
    return z2


if __name__ == "__main__":
    dim1, dim2 = 3, 3
    N, C, V, T = 2, dim1, 25, 40

    # NTU-style 25-joint limb partition: (left_arm, right_arm, left_leg,
    # right_leg, head_spine) — the constructor-unpacking order.
    limb_blocks = (
        [8, 9, 10, 11, 23, 24],
        [4, 5, 6, 7, 21, 22],
        [16, 17, 18, 19],
        [12, 13, 14, 15],
        [0, 1, 2, 3, 20],
    )

    keys = jax.random.split(jax.random.PRNGKey(0), 8)
    x = jax.random.normal(keys[0], (N, C, V, T), jnp.float32)

    # Deterministic parameter init (synthetic weights, eval-mode BN folded).
    wc = 0.4 * jax.random.normal(keys[1], (dim2, 2 * dim1), jnp.float32)
    w1 = 0.4 * jax.random.normal(keys[2], (dim2, dim2, 3), jnp.float32)
    w2 = 0.4 * jax.random.normal(keys[3], (dim2, dim2), jnp.float32)

    def bn_fold(k_):
        ks = jax.random.split(k_, 4)
        gamma = 1.0 + 0.1 * jax.random.normal(ks[0], (dim2,), jnp.float32)
        beta = 0.1 * jax.random.normal(ks[1], (dim2,), jnp.float32)
        mean = 0.1 * jax.random.normal(ks[2], (dim2,), jnp.float32)
        var = jax.random.uniform(ks[3], (dim2,), jnp.float32, minval=0.5, maxval=1.5)
        s = gamma / jnp.sqrt(var + 1e-5)
        return s, beta - mean * s

    s0, b0 = bn_fold(keys[4])
    s1, b1 = bn_fold(keys[5])
    s2, b2 = bn_fold(keys[6])
    params = dict(
        wc=wc, w1=w1, w2=w2,
        scales=jnp.stack([s0, s1, s2], axis=0),
        shifts=jnp.stack([b0, b1, b2], axis=0),
    )

    out = local_forward(x, limb_blocks, params)
    out = jax.block_until_ready(out)
    assert out.shape == (N, dim2, 1, 20), out.shape

    ref = ref_forward(x, limb_blocks, params)
    if not np.allclose(np.asarray(out), np.asarray(ref), atol=1e-4, rtol=1e-4):
        raise AssertionError("Pallas output does not match JAX reference")

    print("KERNEL_OK")
</pallas_src>

<mosaic_0001>
module attributes {stable_mosaic.version = 11 : i64} {
  func.func @_local_kernel(%arg0: i32, %arg1: memref<1x3x50x40xf32, #tpu.memory_space<vmem>>, %arg2: memref<5x50x1xf32, #tpu.memory_space<vmem>>, %arg3: memref<2x40xf32, #tpu.memory_space<vmem>>, %arg4: memref<3x3xf32, #tpu.memory_space<vmem>>, %arg5: memref<3x3xf32, #tpu.memory_space<vmem>>, %arg6: memref<3x9xf32, #tpu.memory_space<vmem>>, %arg7: memref<3x3xf32, #tpu.memory_space<vmem>>, %arg8: memref<3x3x1xf32, #tpu.memory_space<vmem>>, %arg9: memref<3x3x1xf32, #tpu.memory_space<vmem>>, %arg10: memref<1x3x40xf32, #tpu.memory_space<vmem>>) attributes {dimension_semantics = [#tpu.dimension_semantics<parallel>], iteration_bounds = array<i64: 1>, scalar_prefetch = 0 : i64, scratch_operands = 0 : i64, tpu.core_type = #tpu.core_type<tc>, window_params = [{transform_indices = @transform_0, window_bounds = array<i64: 1, 3, 50, 40>}, {pipeline_mode = #tpu.pipeline_mode<synchronous>, transform_indices = @transform_1, window_bounds = array<i64: 5, 50, 1>}, {pipeline_mode = #tpu.pipeline_mode<synchronous>, transform_indices = @transform_2, window_bounds = array<i64: 2, 40>}, {pipeline_mode = #tpu.pipeline_mode<synchronous>, transform_indices = @transform_3, window_bounds = array<i64: 3, 3>}, {pipeline_mode = #tpu.pipeline_mode<synchronous>, transform_indices = @transform_4, window_bounds = array<i64: 3, 3>}, {pipeline_mode = #tpu.pipeline_mode<synchronous>, transform_indices = @transform_5, window_bounds = array<i64: 3, 9>}, {pipeline_mode = #tpu.pipeline_mode<synchronous>, transform_indices = @transform_6, window_bounds = array<i64: 3, 3>}, {pipeline_mode = #tpu.pipeline_mode<synchronous>, transform_indices = @transform_7, window_bounds = array<i64: 3, 3, 1>}, {pipeline_mode = #tpu.pipeline_mode<synchronous>, transform_indices = @transform_8, window_bounds = array<i64: 3, 3, 1>}, {transform_indices = @transform_9, window_bounds = array<i64: 1, 3, 40>}]} {
    %c0 = arith.constant 0 : index
    %c0_0 = arith.constant 0 : index
    %c0_1 = arith.constant 0 : index
    %c0_2 = arith.constant 0 : index
    %0 = vector.load %arg1[%c0, %c0_0, %c0_1, %c0_2] : memref<1x3x50x40xf32, #tpu.memory_space<vmem>>, vector<1x3x50x40xf32>
    %1 = vector.shape_cast %0 : vector<1x3x50x40xf32> to vector<3x50x40xf32>
    %c0_3 = arith.constant 0 : index
    %c0_4 = arith.constant 0 : index
    %c0_5 = arith.constant 0 : index
    %2 = vector.load %arg2[%c0_3, %c0_4, %c0_5] : memref<5x50x1xf32, #tpu.memory_space<vmem>>, vector<1x50x1xf32>
    %3 = vector.shape_cast %2 : vector<1x50x1xf32> to vector<50x1xf32>
    %4 = vector.shape_cast %3 : vector<50x1xf32> to vector<1x50x1xf32>
    %5 = vector.broadcast %4 : vector<1x50x1xf32> to vector<3x50x40xf32>
    %6 = arith.addf %1, %5 : vector<3x50x40xf32>
    %cst = arith.constant dense<0xFF800000> : vector<3x40xf32>
    %7 = vector.multi_reduction <maximumf>, %6, %cst [1] : vector<3x50x40xf32> to vector<3x40xf32>
    %c1 = arith.constant 1 : index
    %c0_6 = arith.constant 0 : index
    %c0_7 = arith.constant 0 : index
    %8 = vector.load %arg2[%c1, %c0_6, %c0_7] : memref<5x50x1xf32, #tpu.memory_space<vmem>>, vector<1x50x1xf32>
    %9 = vector.shape_cast %8 : vector<1x50x1xf32> to vector<50x1xf32>
    %10 = vector.shape_cast %9 : vector<50x1xf32> to vector<1x50x1xf32>
    %11 = vector.broadcast %10 : vector<1x50x1xf32> to vector<3x50x40xf32>
    %12 = arith.addf %1, %11 : vector<3x50x40xf32>
    %cst_8 = arith.constant dense<0xFF800000> : vector<3x40xf32>
    %13 = vector.multi_reduction <maximumf>, %12, %cst_8 [1] : vector<3x50x40xf32> to vector<3x40xf32>
    %14 = arith.addf %7, %13 : vector<3x40xf32>
    %15 = arith.maximumf %7, %13 : vector<3x40xf32>
    %c2 = arith.constant 2 : index
    %c0_9 = arith.constant 0 : index
    %c0_10 = arith.constant 0 : index
    %16 = vector.load %arg2[%c2, %c0_9, %c0_10] : memref<5x50x1xf32, #tpu.memory_space<vmem>>, vector<1x50x1xf32>
    %17 = vector.shape_cast %16 : vector<1x50x1xf32> to vector<50x1xf32>
    %18 = vector.shape_cast %17 : vector<50x1xf32> to vector<1x50x1xf32>
    %19 = vector.broadcast %18 : vector<1x50x1xf32> to vector<3x50x40xf32>
    %20 = arith.addf %1, %19 : vector<3x50x40xf32>
    %cst_11 = arith.constant dense<0xFF800000> : vector<3x40xf32>
    %21 = vector.multi_reduction <maximumf>, %20, %cst_11 [1] : vector<3x50x40xf32> to vector<3x40xf32>
    %22 = arith.addf %14, %21 : vector<3x40xf32>
    %23 = arith.maximumf %15, %21 : vector<3x40xf32>
    %c3 = arith.constant 3 : index
    %c0_12 = arith.constant 0 : index
    %c0_13 = arith.constant 0 : index
    %24 = vector.load %arg2[%c3, %c0_12, %c0_13] : memref<5x50x1xf32, #tpu.memory_space<vmem>>, vector<1x50x1xf32>
    %25 = vector.shape_cast %24 : vector<1x50x1xf32> to vector<50x1xf32>
    %26 = vector.shape_cast %25 : vector<50x1xf32> to vector<1x50x1xf32>
    %27 = vector.broadcast %26 : vector<1x50x1xf32> to vector<3x50x40xf32>
    %28 = arith.addf %1, %27 : vector<3x50x40xf32>
    %cst_14 = arith.constant dense<0xFF800000> : vector<3x40xf32>
    %29 = vector.multi_reduction <maximumf>, %28, %cst_14 [1] : vector<3x50x40xf32> to vector<3x40xf32>
    %30 = arith.addf %22, %29 : vector<3x40xf32>
    %31 = arith.maximumf %23, %29 : vector<3x40xf32>
    %c4 = arith.constant 4 : index
    %c0_15 = arith.constant 0 : index
    %c0_16 = arith.constant 0 : index
    %32 = vector.load %arg2[%c4, %c0_15, %c0_16] : memref<5x50x1xf32, #tpu.memory_space<vmem>>, vector<1x50x1xf32>
    %33 = vector.shape_cast %32 : vector<1x50x1xf32> to vector<50x1xf32>
    %34 = vector.shape_cast %33 : vector<50x1xf32> to vector<1x50x1xf32>
    %35 = vector.broadcast %34 : vector<1x50x1xf32> to vector<3x50x40xf32>
    %36 = arith.addf %1, %35 : vector<3x50x40xf32>
    %cst_17 = arith.constant dense<0xFF800000> : vector<3x40xf32>
    %37 = vector.multi_reduction <maximumf>, %36, %cst_17 [1] : vector<3x50x40xf32> to vector<3x40xf32>
    %38 = arith.addf %30, %37 : vector<3x40xf32>
    %39 = arith.maximumf %31, %37 : vector<3x40xf32>
    %cst_18 = arith.constant 2.000000e-01 : f32
    %40 = vector.broadcast %cst_18 : f32 to vector<3x40xf32>
    %41 = arith.mulf %38, %40 : vector<3x40xf32>
    %c0_19 = arith.constant 0 : index
    %c0_20 = arith.constant 0 : index
    %42 = vector.load %arg4[%c0_19, %c0_20] : memref<3x3xf32, #tpu.memory_space<vmem>>, vector<3x3xf32>
    %cst_21 = arith.constant dense<0.000000e+00> : vector<3x40xf32>
    %43 = tpu.matmul %42, %39, %cst_21 {dimension_numbers = #tpu.dot_dimension_numbers<[1], [0], [0], [1], [0, 0, 1, 1], [], []>, precision = #tpu.contract_precision<fp32>} : vector<3x3xf32>, vector<3x40xf32>, vector<3x40xf32> -> vector<3x40xf32>
    %c0_22 = arith.constant 0 : index
    %c0_23 = arith.constant 0 : index
    %44 = vector.load %arg5[%c0_22, %c0_23] : memref<3x3xf32, #tpu.memory_space<vmem>>, vector<3x3xf32>
    %cst_24 = arith.constant dense<0.000000e+00> : vector<3x40xf32>
    %45 = tpu.matmul %44, %41, %cst_24 {dimension_numbers = #tpu.dot_dimension_numbers<[1], [0], [0], [1], [0, 0, 1, 1], [], []>, precision = #tpu.contract_precision<fp32>} : vector<3x3xf32>, vector<3x40xf32>, vector<3x40xf32> -> vector<3x40xf32>
    %46 = arith.addf %43, %45 : vector<3x40xf32>
    %c0_25 = arith.constant 0 : index
    %c0_26 = arith.constant 0 : index
    %c0_27 = arith.constant 0 : index
    %47 = vector.load %arg8[%c0_25, %c0_26, %c0_27] : memref<3x3x1xf32, #tpu.memory_space<vmem>>, vector<1x3x1xf32>
    %48 = vector.shape_cast %47 : vector<1x3x1xf32> to vector<3x1xf32>
    %49 = vector.broadcast %48 : vector<3x1xf32> to vector<3x40xf32>
    %50 = arith.mulf %46, %49 : vector<3x40xf32>
    %c0_28 = arith.constant 0 : index
    %c0_29 = arith.constant 0 : index
    %c0_30 = arith.constant 0 : index
    %51 = vector.load %arg9[%c0_28, %c0_29, %c0_30] : memref<3x3x1xf32, #tpu.memory_space<vmem>>, vector<1x3x1xf32>
    %52 = vector.shape_cast %51 : vector<1x3x1xf32> to vector<3x1xf32>
    %53 = vector.broadcast %52 : vector<3x1xf32> to vector<3x40xf32>
    %54 = arith.addf %50, %53 : vector<3x40xf32>
    %cst_31 = arith.constant 0.000000e+00 : f32
    %55 = vector.broadcast %cst_31 : f32 to vector<3x40xf32>
    %56 = arith.maximumf %54, %55 : vector<3x40xf32>
    %c0_32 = arith.constant 0 : index
    %c0_33 = arith.constant 0 : index
    %57 = vector.load %arg3[%c0_32, %c0_33] : memref<2x40xf32, #tpu.memory_space<vmem>>, vector<1x40xf32>
    %c1_34 = arith.constant 1 : index
    %c0_35 = arith.constant 0 : index
    %58 = vector.load %arg3[%c1_34, %c0_35] : memref<2x40xf32, #tpu.memory_space<vmem>>, vector<1x40xf32>
    %cst_36 = arith.constant 0.000000e+00 : f32
    %59 = vector.broadcast %cst_36 : f32 to vector<3x1xf32>
    %60 = vector.extract_strided_slice %56 {offsets = [0, 0], sizes = [3, 39], strides = [1, 1]} : vector<3x40xf32> to vector<3x39xf32>
    %61 = tpu.concatenate %59, %60 in 1 : vector<3x1xf32>, vector<3x39xf32> -> vector<3x40xf32>
    %62 = vector.broadcast %57 : vector<1x40xf32> to vector<3x40xf32>
    %63 = arith.mulf %61, %62 : vector<3x40xf32>
    %64 = vector.extract_strided_slice %56 {offsets = [0, 1], sizes = [3, 39], strides = [1, 1]} : vector<3x40xf32> to vector<3x39xf32>
    %65 = tpu.concatenate %64, %59 in 1 : vector<3x39xf32>, vector<3x1xf32> -> vector<3x40xf32>
    %66 = vector.broadcast %58 : vector<1x40xf32> to vector<3x40xf32>
    %67 = arith.mulf %65, %66 : vector<3x40xf32>
    %68 = tpu.concatenate %63, %56, %67 in 0 : vector<3x40xf32>, vector<3x40xf32>, vector<3x40xf32> -> vector<9x40xf32>
    %c0_37 = arith.constant 0 : index
    %c0_38 = arith.constant 0 : index
    %69 = vector.load %arg6[%c0_37, %c0_38] : memref<3x9xf32, #tpu.memory_space<vmem>>, vector<3x9xf32>
    %cst_39 = arith.constant dense<0.000000e+00> : vector<3x40xf32>
    %70 = tpu.matmul %69, %68, %cst_39 {dimension_numbers = #tpu.dot_dimension_numbers<[1], [0], [0], [1], [0, 0, 1, 1], [], []>, precision = #tpu.contract_precision<fp32>} : vector<3x9xf32>, vector<9x40xf32>, vector<3x40xf32> -> vector<3x40xf32>
    %c1_40 = arith.constant 1 : index
    %c0_41 = arith.constant 0 : index
    %c0_42 = arith.constant 0 : index
    %71 = vector.load %arg8[%c1_40, %c0_41, %c0_42] : memref<3x3x1xf32, #tpu.memory_space<vmem>>, vector<1x3x1xf32>
    %72 = vector.shape_cast %71 : vector<1x3x1xf32> to vector<3x1xf32>
    %73 = vector.broadcast %72 : vector<3x1xf32> to vector<3x40xf32>
    %74 = arith.mulf %70, %73 : vector<3x40xf32>
    %c1_43 = arith.constant 1 : index
    %c0_44 = arith.constant 0 : index
    %c0_45 = arith.constant 0 : index
    %75 = vector.load %arg9[%c1_43, %c0_44, %c0_45] : memref<3x3x1xf32, #tpu.memory_space<vmem>>, vector<1x3x1xf32>
    %76 = vector.shape_cast %75 : vector<1x3x1xf32> to vector<3x1xf32>
    %77 = vector.broadcast %76 : vector<3x1xf32> to vector<3x40xf32>
    %78 = arith.addf %74, %77 : vector<3x40xf32>
    %cst_46 = arith.constant 0.000000e+00 : f32
    %79 = vector.broadcast %cst_46 : f32 to vector<3x40xf32>
    %80 = arith.maximumf %78, %79 : vector<3x40xf32>
    %c0_47 = arith.constant 0 : index
    %c0_48 = arith.constant 0 : index
    %81 = vector.load %arg7[%c0_47, %c0_48] : memref<3x3xf32, #tpu.memory_space<vmem>>, vector<3x3xf32>
    %cst_49 = arith.constant dense<0.000000e+00> : vector<3x40xf32>
    %82 = tpu.matmul %81, %80, %cst_49 {dimension_numbers = #tpu.dot_dimension_numbers<[1], [0], [0], [1], [0, 0, 1, 1], [], []>, precision = #tpu.contract_precision<fp32>} : vector<3x3xf32>, vector<3x40xf32>, vector<3x40xf32> -> vector<3x40xf32>
    %c2_50 = arith.constant 2 : index
    %c0_51 = arith.constant 0 : index
    %c0_52 = arith.constant 0 : index
    %83 = vector.load %arg8[%c2_50, %c0_51, %c0_52] : memref<3x3x1xf32, #tpu.memory_space<vmem>>, vector<1x3x1xf32>
    %84 = vector.shape_cast %83 : vector<1x3x1xf32> to vector<3x1xf32>
    %85 = vector.broadcast %84 : vector<3x1xf32> to vector<3x40xf32>
    %86 = arith.mulf %82, %85 : vector<3x40xf32>
    %c2_53 = arith.constant 2 : index
    %c0_54 = arith.constant 0 : index
    %c0_55 = arith.constant 0 : index
    %87 = vector.load %arg9[%c2_53, %c0_54, %c0_55] : memref<3x3x1xf32, #tpu.memory_space<vmem>>, vector<1x3x1xf32>
    %88 = vector.shape_cast %87 : vector<1x3x1xf32> to vector<3x1xf32>
    %89 = vector.broadcast %88 : vector<3x1xf32> to vector<3x40xf32>
    %90 = arith.addf %86, %89 : vector<3x40xf32>
    %cst_56 = arith.constant 0.000000e+00 : f32
    %91 = vector.broadcast %cst_56 : f32 to vector<3x40xf32>
    %92 = arith.maximumf %90, %91 : vector<3x40xf32>
    %c0_57 = arith.constant 0 : index
    %c0_58 = arith.constant 0 : index
    %c0_59 = arith.constant 0 : index
    %93 = vector.load %arg10[%c0_57, %c0_58, %c0_59] : memref<1x3x40xf32, #tpu.memory_space<vmem>>, vector<1x3x40xf32>
    %94 = vector.shape_cast %93 : vector<1x3x40xf32> to vector<3x40xf32>
    %95 = vector.shape_cast %92 : vector<3x40xf32> to vector<1x3x40xf32>
    tpu.vector_store %arg10[%c0_57, %c0_58, %c0_59], %95 {strides = array<i32>} : memref<1x3x40xf32, #tpu.memory_space<vmem>>, vector<1x3x40xf32>,
    return
  }
  func.func @transform_0(%arg0: i32) -> (i32, i32, i32, i32) {
    %c0_i32 = arith.constant 0 : i32
    %c0_i32_0 = arith.constant 0 : i32
    %c0_i32_1 = arith.constant 0 : i32
    %c0_i32_2 = arith.constant 0 : i32
    return %arg0, %c0_i32, %c0_i32_0, %c0_i32_1 : i32, i32, i32, i32
  }
  func.func @transform_1(%arg0: i32) -> (i32, i32, i32) {
    %c0_i32 = arith.constant 0 : i32
    %c0_i32_0 = arith.constant 0 : i32
    %c0_i32_1 = arith.constant 0 : i32
    %c0_i32_2 = arith.constant 0 : i32
    return %c0_i32, %c0_i32_0, %c0_i32_1 : i32, i32, i32
  }
  func.func @transform_2(%arg0: i32) -> (i32, i32) {
    %c0_i32 = arith.constant 0 : i32
    %c0_i32_0 = arith.constant 0 : i32
    %c0_i32_1 = arith.constant 0 : i32
    return %c0_i32, %c0_i32_0 : i32, i32
  }
  func.func @transform_3(%arg0: i32) -> (i32, i32) {
    %c0_i32 = arith.constant 0 : i32
    %c0_i32_0 = arith.constant 0 : i32
    %c0_i32_1 = arith.constant 0 : i32
    return %c0_i32, %c0_i32_0 : i32, i32
  }
  func.func @transform_4(%arg0: i32) -> (i32, i32) {
    %c0_i32 = arith.constant 0 : i32
    %c0_i32_0 = arith.constant 0 : i32
    %c0_i32_1 = arith.constant 0 : i32
    return %c0_i32, %c0_i32_0 : i32, i32
  }
  func.func @transform_5(%arg0: i32) -> (i32, i32) {
    %c0_i32 = arith.constant 0 : i32
    %c0_i32_0 = arith.constant 0 : i32
    %c0_i32_1 = arith.constant 0 : i32
    return %c0_i32, %c0_i32_0 : i32, i32
  }
  func.func @transform_6(%arg0: i32) -> (i32, i32) {
    %c0_i32 = arith.constant 0 : i32
    %c0_i32_0 = arith.constant 0 : i32
    %c0_i32_1 = arith.constant 0 : i32
    return %c0_i32, %c0_i32_0 : i32, i32
  }
  func.func @transform_7(%arg0: i32) -> (i32, i32, i32) {
    %c0_i32 = arith.constant 0 : i32
    %c0_i32_0 = arith.constant 0 : i32
    %c0_i32_1 = arith.constant 0 : i32
    %c0_i32_2 = arith.constant 0 : i32
    return %c0_i32, %c0_i32_0, %c0_i32_1 : i32, i32, i32
  }
  func.func @transform_8(%arg0: i32) -> (i32, i32, i32) {
    %c0_i32 = arith.constant 0 : i32
    %c0_i32_0 = arith.constant 0 : i32
    %c0_i32_1 = arith.constant 0 : i32
    %c0_i32_2 = arith.constant 0 : i32
    return %c0_i32, %c0_i32_0, %c0_i32_1 : i32, i32, i32
  }
  func.func @transform_9(%arg0: i32) -> (i32, i32, i32) {
    %c0_i32 = arith.constant 0 : i32
    %c0_i32_0 = arith.constant 0 : i32
    %c0_i32_1 = arith.constant 0 : i32
    return %arg0, %c0_i32, %c0_i32_0 : i32, i32, i32
  }
}

</mosaic_0001>

<bundles_post_ra>
// kernel: tpu_custom_call.1
= control target key start
LH: loop header
LB: loop body
LE: loop exit
PB: predicated region body
PF: predicated region fallthrough
CT: control target
= control target key end

     0   :  { %v2898_v0 = vmov 0   ;;  %v3680_v38 = vmov 0.0   ;;  %vm2900_vm0 = vmmov 0   ;;  %vm116_vm1 = vcmask 326656   ;;  %s3670_s1 = inlined_call_operand.vmem [shape: f32[5,50,1], index: 1, kind: input, shape index: {}]   ;;  %s3671_s7 = inlined_call_operand.vmem [shape: f32[3,3,1], index: 7, kind: input, shape index: {}]   ;;  %s3672_s8 = inlined_call_operand.vmem [shape: f32[3,3,1], index: 8, kind: input, shape index: {}]   ;;  %s3673_s0 = inlined_call_operand.vmem [shape: f32[1,3,50,40], index: 0, kind: input, shape index: {}]   ;;  %s3674_s4 = inlined_call_operand.vmem [shape: f32[3,3], index: 4, kind: input, shape index: {}]   ;;  %s3675_s3 = inlined_call_operand.vmem [shape: f32[3,3], index: 3, kind: input, shape index: {}]   ;;  %s3676_s5 = inlined_call_operand.vmem [shape: f32[3,9], index: 5, kind: input, shape index: {}]   ;;  %s3677_s2 = inlined_call_operand.vmem [shape: f32[2,40], index: 2, kind: input, shape index: {}]   ;;  %s3678_s6 = inlined_call_operand.vmem [shape: f32[3,3], index: 6, kind: input, shape index: {}]   ;;  %s3679_s9 = inlined_call_operand.vmem [shape: f32[1,3,40], index: 9, kind: output, shape index: {}]  }
   0x1   :  { %2897 = vset.pattern.permute.xlu1 %v2898_v0  ;;  %2896 = vset.pattern.permute.xlu0 %v2898_v0  ;;  %v2610_v1 = vld [vmem:[%s3670_s1 + $0x38] sm:$0xff]  ;;  %v53_v2 = vld [vmem:[%s3670_s1] sm:$0xff]  ;;  %v2612_v3 = vld [vmem:[%s3670_s1 + $0x48] sm:$0xff]  ;;  %vm127_vm2 = vcmask 320512   ;;  %vm695_vm3 = vcmask 23552   ;;  %vm691_vm4 = vcmask 1041409  }
   0x2   :  { %185 = vperm.xlu1 %2897, %v2610_v1   ;;  %62 = vperm.xlu0 %2896, %v53_v2   ;;  %v55_v4 = vld [vmem:[%s3670_s1 + $0x10] sm:$0xff]  ;;  %v56_v5 = vld [vmem:[%s3670_s1 + $0x18] sm:$0xff]  ;;  %v54_v6 = vld [vmem:[%s3670_s1 + $0x8] sm:$0xff]  ;;  %vm693_vm5 = vcmask 1042434   ;;  %vm699_vm6 = vcmask 1042432   ;;  %vm1651_vm7 = vcmask 72704  }
   0x3   :  { %v2611_v7 = vld [vmem:[%s3670_s1 + $0x40] sm:$0xff]  ;;  %v2614_v9 = vld [vmem:[%s3670_s1 + $0x58] sm:$0xff]  ;;  %v2613_v10 = vld [vmem:[%s3670_s1 + $0x50] sm:$0xff]  ;;  %2698 = vmatprep.subr.mxu0 %v3680_v38  ;;  %2700 = vmatprep.mubr.msk.f32.mxu0 %vm2900_vm0, %v3680_v38  ;;  %vm1625_vm8 = vcmask 7168   ;;  %vm1635_vm9 = vcmask 318464   ;;  %vm1648_vm10 = vcmask 1045504  }
   0x4   :  { %v57_v8 = vld [vmem:[%s3670_s1 + $0x20] sm:$0xff]  ;;  %v2617_v12 = vld [vmem:[%s3670_s1 + $0x70] sm:$0xff]  ;;  %v58_v14 = vld [vmem:[%s3670_s1 + $0x28] sm:$0xff]  ;;  %2762 = vmatprep.mubr.msk.f32.mxu1 %vm2900_vm0, %v3680_v38  ;;  %vm1655_vm11 = vcmask 1040384   ;;  %vm2604_vm12 = vcmask 321536  }
   0x5   :  { %v2619_v11 = vld [vmem:[%s3670_s1 + $0x80] sm:$0xff]  ;;  %v59_v13 = vld [vmem:[%s3670_s1 + $0x30] sm:$0x3]  ;;  %v2616_v15 = vld [vmem:[%s3670_s1 + $0x68] sm:$0x3] }
   0x6   :  { %195 = vperm.xlu1 %2897, %v2612_v3   ;;  %72 = vperm.xlu0 %2896, %v55_v4   ;;  %v2615_v16 = vld [vmem:[%s3670_s1 + $0x60] sm:$0xff]  ;;  %v2620_v17 = vld [vmem:[%s3670_s1 + $0x88] sm:$0xff]  ;;  %v2618_v18 = vld [vmem:[%s3670_s1 + $0x78] sm:$0xff] }
   0x7   :  { %v2624_v19 = vld [vmem:[%s3670_s1 + $0xa8] sm:$0xff]  ;;  %v2621_v20 = vld [vmem:[%s3670_s1 + $0x90] sm:$0xff]  ;;  %v2622_v21 = vld [vmem:[%s3670_s1 + $0x98] sm:$0xff] }
   0x8   :  { %v2626_v22 = vld [vmem:[%s3670_s1 + $0xb8] sm:$0xff]  ;;  %v2625_v23 = vld [vmem:[%s3670_s1 + $0xb0] sm:$0xff]  ;;  %v2623_v24 = vld [vmem:[%s3670_s1 + $0xa0] sm:$0x3] }
   0x9   :  { %v2628_v25 = vld [vmem:[%s3670_s1 + $0xc8] sm:$0xff]  ;;  %v2627_v26 = vld [vmem:[%s3670_s1 + $0xc0] sm:$0xff]  ;;  %v2633_v27 = vld [vmem:[%s3670_s1 + $0xf0] sm:$0xff] }
   0xa   :  { %77 = vperm.xlu1 %2897, %v56_v5   ;;  %67 = vperm.xlu0 %2896, %v54_v6   ;;  %v2631_v28 = vld [vmem:[%s3670_s1 + $0xe0] sm:$0xff]  ;;  %v2630_v29 = vld [vmem:[%s3670_s1 + $0xd8] sm:$0x3]  ;;  %v2629_v30 = vld [vmem:[%s3670_s1 + $0xd0] sm:$0xff] }
   0xb   :  { %v2634_v31 = vld [vmem:[%s3670_s1 + $0xf8] sm:$0xff]  ;;  %v2632_v32 = vld [vmem:[%s3670_s1 + $0xe8] sm:$0xff]  ;;  %v2635_v34 = vld [vmem:[%s3670_s1 + $0x100] sm:$0xff] }
   0xc   :  { %v2636_v33 = vld [vmem:[%s3670_s1 + $0x108] sm:$0xff]  ;;  %v1604_v35 = vld [vmem:[%s3671_s7] sm:$0x7]  ;;  %v2637_v36 = vld [vmem:[%s3670_s1 + $0x110] sm:$0x3]  ;;  %s2903_s1 = smov 127  }
   0xd   :  { %v1611_v37 = vld [vmem:[%s3672_s8] sm:$0x7]  ;;  %v3078_v44 = vld [vmem:[%s3673_s0 + $0x10] sm:$0xff]  ;;  %v3083_v45 = vld [vmem:[%s3673_s0 + $0x48] sm:$0xff] }
   0xe   :  { %190 = vperm.xlu1 %2897, %v2611_v7   ;;  %82 = vperm.xlu0 %2896, %v57_v8   ;;  %v3073_v43 = vld [vmem:[%s3673_s0] sm:$0xff]  ;;  %v3093_v47 = vld [vmem:[%s3673_s0 + $0x38] sm:$0xff]  ;;  %v3098_v48 = vld [vmem:[%s3673_s0 + $0x70] sm:$0xff] }
   0xf   :  { %v3088_v46 = vld [vmem:[%s3673_s0 + $0x80] sm:$0xff]  ;;  %v3116_v62 = vld [vmem:[%s3673_s0 + $0x18] sm:$0xff]  ;;  %v3121_v63 = vld [vmem:[%s3673_s0 + $0x8] sm:$0xff] }
  0x10   :  { %v3138_v6 = vld [vmem:[%s3673_s0 + $0x50] sm:$0xff]  ;;  %v3143_v7 = vld [vmem:[%s3673_s0 + $0x40] sm:$0xff] }
  0x12   :  { %205 = vperm.xlu1 %2897, %v2614_v9   ;;  %200 = vperm.xlu0 %2896, %v2613_v10  }
  0x16   :  { %322 = vperm.xlu1 %2897, %v2619_v11   ;;  %312 = vperm.xlu0 %2896, %v2617_v12   ;;  %v3156_v12 = vld [vmem:[%s3673_s0 + $0x88] sm:$0xff] }
  0x1a   :  { %92 = vperm.xlu1 %2897, %v59_v13   ;;  %87 = vperm.xlu0 %2896, %v58_v14   ;;  %v3161_v13 = vld [vmem:[%s3673_s0 + $0x78] sm:$0xff] }
  0x1e   :  { %215 = vperm.xlu1 %2897, %v2616_v15   ;;  %210 = vperm.xlu0 %2896, %v2615_v16  }
  0x22   :  { %327 = vperm.xlu1 %2897, %v2620_v17   ;;  %317 = vperm.xlu0 %2896, %v2618_v18   ;;  %v3170_v18 = vld [vmem:[%s3673_s0 + $0x20] sm:$0xff] }
  0x26   :  { %439 = vperm.xlu1 %2897, %v2624_v19   ;;  %332 = vperm.xlu0 %2896, %v2621_v20   ;;  %v3175_v19 = vld [vmem:[%s3673_s0 + $0x58] sm:$0xff] }
  0x2a   :  { %337 = vperm.xlu1 %2897, %v2622_v21   ;;  %449 = vperm.xlu0 %2896, %v2626_v22  }
  0x2e   :  { %444 = vperm.xlu1 %2897, %v2625_v23   ;;  %342 = vperm.xlu0 %2896, %v2623_v24   ;;  %v3185_v24 = vld [vmem:[%s3673_s0 + $0x90] sm:$0xff] }
  0x32   :  { %459 = vperm.xlu1 %2897, %v2628_v25   ;;  %454 = vperm.xlu0 %2896, %v2627_v26  }
  0x36   :  { %576 = vperm.xlu1 %2897, %v2633_v27   ;;  %566 = vperm.xlu0 %2896, %v2631_v28  }
  0x3a   :  { %469 = vperm.xlu1 %2897, %v2630_v29   ;;  %464 = vperm.xlu0 %2896, %v2629_v30  }
  0x3e   :  { %581 = vperm.xlu1 %2897, %v2634_v31   ;;  %571 = vperm.xlu0 %2896, %v2632_v32  }
  0x42   :  { %591 = vperm.xlu1 %2897, %v2636_v33   ;;  %586 = vperm.xlu0 %2896, %v2635_v34  }
  0x46   :  { %1607 = vperm.xlu1 %2897, %v1604_v35   ;;  %596 = vperm.xlu0 %2896, %v2637_v36  }
  0x4a   :  { %1614 = vperm.xlu0 %2896, %v1611_v37  }
  0x81   :  { %v186_v39 = vpop.permute.xlu1 %185  ;;  %v63_v40 = vpop.permute.xlu0 %62 }
  0x82   :  { %v218_v49 = vadd.f32 %v186_v39, %v3073_v43  ;;  %v225_v52 = vadd.f32 %v186_v39, %v3093_v47  ;;  %v232_v53 = vadd.f32 %v186_v39, %v3098_v48  ;;  %v95_v54 = vadd.f32 %v63_v40, %v3073_v43 }
  0x83   :  { %v102_v58 = vadd.f32 %v63_v40, %v3093_v47  ;;  %v109_v59 = vadd.f32 %v63_v40, %v3098_v48 }
  0x84   :  { %v3110_v60 = vsel %vm116_vm1, %v218_v49, -inf  ;;  %v3124_v2 = vsel %vm116_vm1, %v225_v52, -inf  ;;  %v3127_v3 = vsel %vm116_vm1, %v232_v53, -inf  ;;  %v3130_v4 = vsel %vm116_vm1, %v95_v54, -inf }
  0x85   :  { %v196_v41 = vpop.permute.xlu1 %195  ;;  %v73_v42 = vpop.permute.xlu0 %72  ;;  %v137_v14 = vsel %vm116_vm1, %v102_v58, -inf  ;;  %v156_v15 = vsel %vm116_vm1, %v109_v59, -inf }
  0x86   :  { %v220_v55 = vadd.f32 %v196_v41, %v3078_v44  ;;  %v227_v56 = vadd.f32 %v196_v41, %v3083_v45  ;;  %v234_v57 = vadd.f32 %v196_v41, %v3088_v46  ;;  %v97_v61 = vadd.f32 %v73_v42, %v3078_v44 }
  0x87   :  { %v104_v10 = vadd.f32 %v73_v42, %v3083_v45  ;;  %v111_v11 = vadd.f32 %v73_v42, %v3088_v46 }
  0x88   :  { %v3133_v5 = vsel %vm116_vm1, %v220_v55, -inf  ;;  %v3146_v8 = vsel %vm116_vm1, %v227_v56, -inf  ;;  %v3149_v9 = vsel %vm116_vm1, %v234_v57, -inf  ;;  %v119_v21 = vsel %vm116_vm1, %v97_v61, -inf  ;;  %v3217_v61 = vld [vmem:[%s3673_s0 + $0x30] sm:$0x3] }
  0x89   :  { %v78_v50 = vpop.permute.xlu1 %77  ;;  %v68_v51 = vpop.permute.xlu0 %67  ;;  %v139_v31 = vsel %vm116_vm1, %v104_v10, -inf  ;;  %v158_v32 = vsel %vm116_vm1, %v111_v11, -inf  ;;  %v120_v35 = vmax.f32 %v3130_v4, %v119_v21 }
  0x8a   :  { %v98_v16 = vadd.f32 %v78_v50, %v3116_v62  ;;  %v96_v17 = vadd.f32 %v68_v51, %v3121_v63  ;;  %v105_v22 = vadd.f32 %v78_v50, %v3138_v6  ;;  %v103_v23 = vadd.f32 %v68_v51, %v3143_v7 }
  0x8b   :  { %v112_v29 = vadd.f32 %v78_v50, %v3156_v12  ;;  %v110_v30 = vadd.f32 %v68_v51, %v3161_v13  ;;  %v140_v52 = vmax.f32 %v137_v14, %v139_v31  ;;  %v159_v53 = vmax.f32 %v156_v15, %v158_v32  ;;  %v3225_v14 = vld [vmem:[%s3673_s0 + $0x68] sm:$0x3] }
  0x8c   :  { %v121_v36 = vsel %vm116_vm1, %v98_v16, -inf  ;;  %v118_v37 = vsel %vm116_vm1, %v96_v17, -inf  ;;  %v141_v40 = vsel %vm116_vm1, %v105_v22, -inf  ;;  %v138_v41 = vsel %vm116_vm1, %v103_v23, -inf  ;;  %v3235_v23 = vld [vmem:[%s3673_s0 + $0xa0] sm:$0x3] }
  0x8d   :  { %v191_v0 = vpop.permute.xlu1 %190  ;;  %v83_v1 = vpop.permute.xlu0 %82  ;;  %v160_v54 = vsel %vm116_vm1, %v112_v29, -inf  ;;  %v157_v55 = vsel %vm116_vm1, %v110_v30, -inf  ;;  %v122_v56 = vmax.f32 %v118_v37, %v121_v36 }
  0x8e   :  { %v99_v33 = vadd.f32 %v83_v1, %v3170_v18  ;;  %v106_v34 = vadd.f32 %v83_v1, %v3175_v19  ;;  %v113_v39 = vadd.f32 %v83_v1, %v3185_v24  ;;  %v219_v42 = vadd.f32 %v191_v0, %v3121_v63 }
  0x8f   :  { %v226_v49 = vadd.f32 %v191_v0, %v3143_v7  ;;  %v142_v1 = vmax.f32 %v138_v41, %v141_v40  ;;  %v161_v15 = vmax.f32 %v157_v55, %v160_v54  ;;  %v3228_v16 = vadd.f32 %v191_v0, %v3161_v13  ;;  %v3242_v0 = vld [vmem:[%s3673_s0 + $0x28] sm:$0xff]  ;;  %v3255_v40 = vld [vmem:[%s3673_s0 + $0x98] sm:$0xff] }
  0x90   :  { %v123_v57 = vsel %vm116_vm1, %v99_v33, -inf  ;;  %v143_v58 = vsel %vm116_vm1, %v106_v34, -inf  ;;  %v162_v4 = vsel %vm116_vm1, %v113_v39, -inf  ;;  %v240_v17 = vsel %vm116_vm1, %v219_v42, -inf  ;;  %v3247_v34 = vld [vmem:[%s3673_s0 + $0x60] sm:$0xff] }
  0x91   :  { %v206_v25 = vpop.permute.xlu1 %205  ;;  %v201_v26 = vpop.permute.xlu0 %200  ;;  %v259_v21 = vsel %vm116_vm1, %v226_v49, -inf  ;;  %v124_v30 = vmax.f32 %v120_v35, %v123_v57  ;;  %v144_v31 = vmax.f32 %v140_v52, %v143_v58  ;;  %v163_v36 = vmax.f32 %v159_v53, %v162_v4 }
  0x92   :  { %v222_v59 = vadd.f32 %v206_v25, %v3170_v18  ;;  %v229_v10 = vadd.f32 %v206_v25, %v3175_v19  ;;  %v221_v11 = vadd.f32 %v201_v26, %v3116_v62  ;;  %v228_v32 = vadd.f32 %v201_v26, %v3138_v6 }
  0x93   :  { %v236_v37 = vadd.f32 %v206_v25, %v3185_v24  ;;  %v235_v42 = vadd.f32 %v201_v26, %v3156_v12 }
  0x94   :  { %v245_v35 = vsel %vm116_vm1, %v222_v59, -inf  ;;  %v264_v41 = vsel %vm116_vm1, %v229_v10, -inf  ;;  %v243_v49 = vsel %vm116_vm1, %v221_v11, -inf  ;;  %v262_v58 = vsel %vm116_vm1, %v228_v32, -inf }
  0x95   :  { %v3205_v50 = vpop.permute.xlu1 %322  ;;  %v3207_v51 = vpop.permute.xlu0 %312 }
  0x99   :  { %v93_v22 = vpop.permute.xlu1 %92  ;;  %v88_v29 = vpop.permute.xlu0 %87 }
  0x9a   :  { %v101_v33 = vadd.f32 %v93_v22, %v3217_v61  ;;  %v108_v39 = vadd.f32 %v93_v22, %v3225_v14  ;;  %v115_v52 = vadd.f32 %v93_v22, %v3235_v23  ;;  %v100_v54 = vadd.f32 %v88_v29, %v3242_v0 }
  0x9b   :  { %v107_v55 = vadd.f32 %v88_v29, %v3247_v34  ;;  %v114_v26 = vadd.f32 %v88_v29, %v3255_v40 }
  0x9c   :  { %v128_v53 = vsel %vm127_vm2, %v101_v33, -inf  ;;  %v147_v25 = vsel %vm127_vm2, %v108_v39, -inf  ;;  %v166_v4 = vsel %vm127_vm2, %v115_v52, -inf  ;;  %v125_v22 = vsel %vm116_vm1, %v100_v54, -inf }
  0x9d   :  { %v216_v57 = vpop.permute.xlu1 %215  ;;  %v129_v59 = vmax.f32 %v124_v30, %v128_v53  ;;  %v211_v10 = vpop.permute.xlu0 %210  ;;  %v148_v11 = vmax.f32 %v144_v31, %v147_v25  ;;  %v145_v33 = vsel %vm116_vm1, %v107_v55, -inf  ;;  %v126_v38 = vmax.f32 %v122_v56, %v125_v22 }
  0x9e   :  { %v224_v39 = vadd.f32 %v216_v57, %v3217_v61  ;;  %v146_v28 = vmax.f32 %v142_v1, %v145_v33  ;;  %v164_v27 = vsel %vm116_vm1, %v114_v26, -inf  ;;  %v231_v20 = vadd.f32 %v216_v57, %v3225_v14 }
  0x9f   :  { %v3682_v30 = vmax.f32 %v3110_v60, %v3133_v5  ;;  %v167_v52 = vmax.f32 %v163_v36, %v166_v4  ;;  %v165_v29 = vmax.f32 %v161_v15, %v164_v27  ;;  %v223_v31 = vadd.f32 %v211_v10, %v3242_v0 }
  0xa0   :  { %v3683_v53 = vmax.f32 %v3124_v2, %v3146_v8  ;;  %v283_v54 = vsel %vm116_vm1, %v236_v37, -inf  ;;  %v130_v56 = vmax.f32 %v129_v59, %v126_v38  ;;  %v249_v1 = vsel %vm127_vm2, %v224_v39, -inf  ;;  %v687_v39 = vld [vmem:[%s3674_s4] sm:$0x7] }
  0xa1   :  { %v246_v32 = vmax.f32 %v3682_v30, %v245_v35  ;;  %v244_v55 = vmax.f32 %v240_v17, %v243_v49  ;;  %v263_v26 = vmax.f32 %v259_v21, %v262_v58  ;;  %v268_v22 = vsel %vm127_vm2, %v231_v20, -inf  ;;  %v328_v2 = vpop.permute.xlu1 %327  ;;  %v318_v49 = vpop.permute.xlu0 %317 }
  0xa2   :  { %v265_v25 = vmax.f32 %v3683_v53, %v264_v41  ;;  %v230_v60 = vadd.f32 %v211_v10, %v3247_v34  ;;  %v281_v5 = vsel %vm116_vm1, %v235_v42, -inf  ;;  %v149_v27 = vmax.f32 %v148_v11, %v146_v28 }
  0xa3   :  { %v238_v15 = vadd.f32 %v216_v57, %v3235_v23  ;;  %v237_v36 = vadd.f32 %v211_v10, %v3255_v40  ;;  %v168_v8 = vmax.f32 %v167_v52, %v165_v29  ;;  %v250_v35 = vmax.f32 %v246_v32, %v249_v1 }
  0xa4   :  { %v247_v38 = vsel %vm116_vm1, %v223_v31, -inf  ;;  %v266_v37 = vsel %vm116_vm1, %v230_v60, -inf  ;;  %v131_v17 = vrot.slane %v130_v56, 4  ;;  %v269_v21 = vmax.f32 %v265_v25, %v268_v22 }
  0xa5   :  { %v248_v41 = vmax.f32 %v244_v55, %v247_v38  ;;  %v267_v20 = vmax.f32 %v263_v26, %v266_v37  ;;  %v278_v28 = vsel %vm116_vm1, %v3228_v16, -inf  ;;  %v3684_v42 = vmax.f32 %v3127_v3, %v3149_v9  ;;  %v3299_v52 = vpop.permute.xlu1 %439  ;;  %v333_v1 = vpop.permute.xlu0 %332 }
  0xa6   :  { %v287_v58 = vsel %vm127_vm2, %v238_v15, -inf  ;;  %v285_v59 = vsel %vm116_vm1, %v237_v36, -inf  ;;  %v282_v4 = vmax.f32 %v278_v28, %v281_v5  ;;  %v150_v10 = vrot.slane %v149_v27, 4 }
  0xa7   :  { %v284_v57 = vmax.f32 %v3684_v42, %v283_v54  ;;  %v169_v11 = vrot.slane %v168_v8, 4  ;;  %v251_v33 = vmax.f32 %v250_v35, %v248_v41  ;;  %v132_v30 = vmax.f32 %v130_v56, %v131_v17 }
  0xa8   :  { %v270_v32 = vmax.f32 %v269_v21, %v267_v20  ;;  %v286_v29 = vmax.f32 %v282_v4, %v285_v59  ;;  %v347_v3 = vadd.f32 %v3205_v50, %v3078_v44  ;;  %v354_v9 = vadd.f32 %v3205_v50, %v3083_v45 }
  0xa9   :  { %v288_v16 = vmax.f32 %v284_v57, %v287_v58  ;;  %v3306_v31 = vsel %vm695_vm3, %v687_v39, 0  ;;  %v345_v53 = vadd.f32 %v3207_v51, %v3073_v43  ;;  %v151_v25 = vmax.f32 %v149_v27, %v150_v10  ;;  %v338_v27 = vpop.permute.xlu1 %337  ;;  %v3333_v59 = vpop.permute.xlu0 %449 }
  0xaa   :  { %v170_v54 = vmax.f32 %v168_v8, %v169_v11  ;;  %v252_v56 = vrot.slane %v251_v33, 4  ;;  %v352_v55 = vadd.f32 %v3207_v51, %v3093_v47  ;;  %v133_v26 = vrot.slane %v132_v30, 2 }
  0xab   :  { %v271_v22 = vrot.slane %v270_v32, 4  ;;  %v361_v60 = vadd.f32 %v3205_v50, %v3088_v46  ;;  %v359_v5 = vadd.f32 %v3207_v51, %v3098_v48  ;;  %v289_v15 = vmax.f32 %v288_v16, %v286_v29 }
  0xac   :  { %v368_v36 = vsel %vm116_vm1, %v347_v3, -inf  ;;  %v3318_v35 = vsel %vm116_vm1, %v354_v9, -inf  ;;  %v3321_v8 = vand.u32 4294901760, %v3306_v31  ;;  %v366_v38 = vsel %vm116_vm1, %v345_v53, -inf }
  0xad   :  { %v152_v37 = vrot.slane %v151_v25, 2  ;;  %v171_v17 = vrot.slane %v170_v54, 2  ;;  %v253_v21 = vmax.f32 %v251_v33, %v252_v56  ;;  %v385_v50 = vsel %vm116_vm1, %v352_v55, -inf  ;;  %v3346_v56 = vpop.permute.xlu1 %444 }
  0xae   :  { %v134_v41 = vmax.f32 %v132_v30, %v133_v26  ;;  %v272_v20 = vmax.f32 %v270_v32, %v271_v22  ;;  %v348_v51 = vadd.f32 %v328_v2, %v3116_v62  ;;  %v3327_v28 = vsel %vm116_vm1, %v361_v60, -inf }
  0xaf   :  { %v3330_v42 = vsel %vm116_vm1, %v359_v5, -inf  ;;  %v290_v57 = vrot.slane %v289_v15, 4  ;;  %v346_v58 = vadd.f32 %v318_v49, %v3121_v63  ;;  %v369_v4 = vmax.f32 %v366_v38, %v368_v36 }
  0xb0   :  { %v355_v10 = vadd.f32 %v328_v2, %v3138_v6  ;;  %v362_v11 = vadd.f32 %v328_v2, %v3156_v12  ;;  %v353_v33 = vadd.f32 %v318_v49, %v3143_v7  ;;  %v388_v39 = vmax.f32 %v385_v50, %v3318_v35 }
  0xb1   :  { %v3339_v30 = vmax.f32 %v151_v25, %v152_v37  ;;  %v3341_v32 = vmax.f32 %v170_v54, %v171_v17  ;;  %v254_v16 = vrot.slane %v253_v21, 2  ;;  %v407_v29 = vmax.f32 %v3330_v42, %v3327_v28 }
  0xb2   :  { %v135_v3 = vrot.slane %v134_v41, 1  ;;  %v273_v9 = vrot.slane %v272_v20, 2  ;;  %v370_v53 = vsel %vm116_vm1, %v348_v51, -inf  ;;  %v291_v55 = vmax.f32 %v289_v15, %v290_v57  ;;  %v343_v15 = vpop.permute.xlu0 %342 }
  0xb3   :  { %v360_v2 = vadd.f32 %v318_v49, %v3161_v13  ;;  %v367_v26 = vsel %vm116_vm1, %v346_v58, -inf  ;;  %v349_v25 = vadd.f32 %v333_v1, %v3170_v18  ;;  %v389_v54 = vsel %vm116_vm1, %v355_v10, -inf }
  0xb4   :  { %v408_v22 = vsel %vm116_vm1, %v362_v11, -inf  ;;  %v386_v60 = vsel %vm116_vm1, %v353_v33, -inf  ;;  %v356_v5 = vadd.f32 %v333_v1, %v3175_v19  ;;  %v3357_v38 = vmax.f32 %v253_v21, %v254_v16  ;;  %v460_v11 = vpop.permute.xlu1 %459 }
  0xb5   :  { %v350_v49 = vadd.f32 %v338_v27, %v3242_v0  ;;  %v3360_v37 = vmax.f32 %v134_v41, %v135_v3  ;;  %v3362_v17 = vmax.f32 %v272_v20, %v273_v9  ;;  %v371_v50 = vmax.f32 %v367_v26, %v370_v53 }
  0xb6   :  { %v363_v51 = vadd.f32 %v333_v1, %v3185_v24  ;;  %v292_v28 = vrot.slane %v291_v55, 2  ;;  %v390_v42 = vmax.f32 %v386_v60, %v389_v54  ;;  %v405_v57 = vsel %vm116_vm1, %v360_v2, -inf }
  0xb7   :  { %v372_v58 = vsel %vm116_vm1, %v349_v25, -inf  ;;  %v472_v21 = vadd.f32 %v3299_v52, %v3073_v43  ;;  %v479_v10 = vadd.f32 %v3299_v52, %v3093_v47  ;;  %v391_v41 = vsel %vm116_vm1, %v356_v5, -inf }
  0xb8   :  { %v357_v20 = vadd.f32 %v338_v27, %v3247_v34  ;;  %v364_v1 = vadd.f32 %v338_v27, %v3255_v40  ;;  %v374_v16 = vsel %vm116_vm1, %v350_v49, -inf  ;;  %v351_v3 = vadd.f32 %v343_v15, %v3217_v61  ;;  %v455_v27 = vpop.permute.xlu0 %454 }
  0xb9   :  { %v373_v53 = vmax.f32 %v369_v4, %v372_v58  ;;  %v410_v2 = vsel %vm116_vm1, %v363_v51, -inf  ;;  %v358_v26 = vadd.f32 %v343_v15, %v3225_v14  ;;  %v392_v25 = vmax.f32 %v388_v39, %v391_v41 }
  0xba   :  { %v474_v54 = vadd.f32 %v3333_v59, %v3078_v44  ;;  %v365_v60 = vadd.f32 %v343_v15, %v3235_v23  ;;  %v376_v5 = vsel %vm127_vm2, %v351_v3, -inf  ;;  %v375_v35 = vmax.f32 %v371_v50, %v374_v16 }
  0xbb   :  { %v393_v49 = vsel %vm116_vm1, %v357_v20, -inf  ;;  %v377_v36 = vmax.f32 %v373_v53, %v376_v5  ;;  %v395_v9 = vsel %vm127_vm2, %v358_v26, -inf  ;;  %v412_v4 = vsel %vm116_vm1, %v364_v1, -inf  ;;  %v577_v20 = vpop.permute.xlu1 %576 }
  0xbc   :  { %v481_v51 = vadd.f32 %v3333_v59, %v3083_v45  ;;  %v396_v39 = vmax.f32 %v392_v25, %v395_v9  ;;  %v414_v58 = vsel %vm127_vm2, %v365_v60, -inf  ;;  %v409_v41 = vmax.f32 %v405_v57, %v408_v22 }
  0xbd   :  { %v486_v15 = vadd.f32 %v3299_v52, %v3098_v48  ;;  %v411_v3 = vmax.f32 %v407_v29, %v410_v2  ;;  %v488_v50 = vadd.f32 %v3333_v59, %v3088_v46  ;;  %v3394_v16 = vmax.f32 %v291_v55, %v292_v28  ;;  %v3403_v55 = vpop.permute.xlu0 %566 }
  0xbe   :  { %v493_v53 = vsel %vm116_vm1, %v472_v21, -inf  ;;  %v394_v1 = vmax.f32 %v390_v42, %v393_v49  ;;  %v378_v26 = vmax.f32 %v377_v36, %v375_v35  ;;  %v512_v5 = vsel %vm116_vm1, %v479_v10, -inf }
  0xbf   :  { %v413_v9 = vmax.f32 %v409_v41, %v412_v4  ;;  %v495_v25 = vsel %vm116_vm1, %v474_v54, -inf  ;;  %v415_v22 = vmax.f32 %v411_v3, %v414_v58  ;;  %v514_v57 = vsel %vm116_vm1, %v481_v51, -inf }
  0xc0   :  { %v473_v52 = vadd.f32 %v3346_v56, %v3121_v63  ;;  %v397_v29 = vmax.f32 %v396_v39, %v394_v1  ;;  %v476_v59 = vadd.f32 %v460_v11, %v3170_v18  ;;  %v533_v28 = vsel %vm116_vm1, %v488_v50, -inf  ;;  %v470_v39 = vpop.permute.xlu1 %469 }
  0xc1   :  { %v480_v36 = vadd.f32 %v3346_v56, %v3143_v7  ;;  %v487_v35 = vadd.f32 %v3346_v56, %v3161_v13  ;;  %v483_v42 = vadd.f32 %v460_v11, %v3175_v19  ;;  %v531_v21 = vsel %vm116_vm1, %v486_v15, -inf }
  0xc2   :  { %v379_v10 = vrot.slane %v378_v26, 4  ;;  %v490_v2 = vadd.f32 %v460_v11, %v3185_v24  ;;  %v475_v54 = vadd.f32 %v455_v27, %v3116_v62  ;;  %v496_v60 = vmax.f32 %v493_v53, %v495_v25 }
  0xc3   :  { %v515_v49 = vmax.f32 %v512_v5, %v514_v57  ;;  %v416_v4 = vmax.f32 %v415_v22, %v413_v9  ;;  %v482_v51 = vadd.f32 %v455_v27, %v3138_v6  ;;  %v534_v58 = vmax.f32 %v531_v21, %v533_v28  ;;  %v465_v22 = vpop.permute.xlu0 %464 }
  0xc4   :  { %v398_v41 = vrot.slane %v397_v29, 4  ;;  %v499_v3 = vsel %vm116_vm1, %v476_v59, -inf  ;;  %v489_v56 = vadd.f32 %v455_v27, %v3156_v12  ;;  %v494_v50 = vsel %vm116_vm1, %v473_v52, -inf }
  0xc5   :  { %v513_v15 = vsel %vm116_vm1, %v480_v36, -inf  ;;  %v532_v11 = vsel %vm116_vm1, %v487_v35, -inf  ;;  %v518_v1 = vsel %vm116_vm1, %v483_v42, -inf  ;;  %v380_v53 = vmax.f32 %v378_v26, %v379_v10 }
  0xc6   :  { %v537_v5 = vsel %vm116_vm1, %v490_v2, -inf  ;;  %v497_v9 = vsel %vm116_vm1, %v475_v54, -inf  ;;  %v478_v25 = vadd.f32 %v470_v39, %v3217_v61  ;;  %v417_v57 = vrot.slane %v416_v4, 4 }
  0xc7   :  { %v500_v59 = vmax.f32 %v496_v60, %v499_v3  ;;  %v516_v27 = vsel %vm116_vm1, %v482_v51, -inf  ;;  %v485_v52 = vadd.f32 %v470_v39, %v3225_v14  ;;  %v399_v28 = vmax.f32 %v397_v29, %v398_v41 }
  0xc8   :  { %v535_v36 = vsel %vm116_vm1, %v489_v56, -inf  ;;  %v601_v35 = vadd.f32 %v577_v20, %v3078_v44  ;;  %v492_v26 = vadd.f32 %v470_v39, %v3235_v23  ;;  %v519_v42 = vmax.f32 %v515_v49, %v518_v1 }
  0xc9   :  { %v538_v21 = vmax.f32 %v534_v58, %v537_v5  ;;  %v498_v10 = vmax.f32 %v494_v50, %v497_v9  ;;  %v608_v2 = vadd.f32 %v577_v20, %v3083_v45  ;;  %v381_v54 = vrot.slane %v380_v53, 2  ;;  %v582_v58 = vpop.permute.xlu1 %581 }
  0xca   :  { %v517_v33 = vmax.f32 %v513_v15, %v516_v27  ;;  %v615_v60 = vadd.f32 %v577_v20, %v3088_v46  ;;  %v503_v51 = vsel %vm127_vm2, %v478_v25, -inf  ;;  %v3432_v3 = vmax.f32 %v416_v4, %v417_v57  ;;  %v572_v46 = vpop.permute.xlu0 %571 }
  0xcb   :  { %v536_v29 = vmax.f32 %v532_v11, %v535_v36  ;;  %v522_v41 = vsel %vm127_vm2, %v485_v52, -inf  ;;  %v541_v44 = vsel %vm127_vm2, %v492_v26, -inf  ;;  %v400_v56 = vrot.slane %v399_v28, 2 }
  0xcc   :  { %v3437_v49 = vsel %vm116_vm1, %v601_v35, -inf  ;;  %v599_v45 = vadd.f32 %v3403_v55, %v3073_v43  ;;  %v477_v39 = vadd.f32 %v465_v22, %v3242_v0  ;;  %v3443_v20 = vsel %vm116_vm1, %v608_v2, -inf }
  0xcd   :  { %v504_v4 = vmax.f32 %v500_v59, %v503_v51  ;;  %v484_v50 = vadd.f32 %v465_v22, %v3247_v34  ;;  %v491_v15 = vadd.f32 %v465_v22, %v3255_v40  ;;  %v3448_v11 = vsel %vm116_vm1, %v615_v60, -inf  ;;  %v592_v60 = vpop.permute.xlu1 %591 }
  0xce   :  { %v523_v1 = vmax.f32 %v519_v42, %v522_v41  ;;  %v542_v5 = vmax.f32 %v538_v21, %v541_v44  ;;  %v501_v9 = vsel %vm116_vm1, %v477_v39, -inf  ;;  %v3451_v43 = vmax.f32 %v380_v53, %v381_v54  ;;  %v587_v51 = vpop.permute.xlu0 %586 }
  0xcf   :  { %v502_v25 = vmax.f32 %v498_v10, %v501_v9  ;;  %v520_v57 = vsel %vm116_vm1, %v484_v50, -inf  ;;  %v539_v27 = vsel %vm116_vm1, %v491_v15, -inf  ;;  %v606_v59 = vadd.f32 %v3403_v55, %v3093_v47 }
  0xd0   :  { %v620_v52 = vsel %vm116_vm1, %v599_v45, -inf  ;;  %v521_v22 = vmax.f32 %v517_v33, %v520_v57  ;;  %v540_v36 = vmax.f32 %v536_v29, %v539_v27  ;;  %v602_v26 = vadd.f32 %v582_v58, %v3116_v62 }
  0xd1   :  { %v505_v35 = vmax.f32 %v504_v4, %v502_v25  ;;  %v609_v42 = vadd.f32 %v582_v58, %v3138_v6  ;;  %v600_v53 = vadd.f32 %v572_v46, %v3121_v63  ;;  %v419_v21 = vrot.slane %v3432_v3, 2 }
  0xd2   :  { %v524_v10 = vmax.f32 %v523_v1, %v521_v22  ;;  %v543_v2 = vmax.f32 %v542_v5, %v540_v36  ;;  %v607_v54 = vadd.f32 %v572_v46, %v3143_v7  ;;  %v3463_v47 = vmax.f32 %v399_v28, %v400_v56  ;;  %v597_v1 = vpop.permute.xlu0 %596 }
  0xd3   :  { %v613_v33 = vadd.f32 %v3403_v55, %v3098_v48  ;;  %v623_v29 = vmax.f32 %v620_v52, %v3437_v49  ;;  %v506_v62 = vrot.slane %v505_v35, 4  ;;  %v639_v6 = vsel %vm116_vm1, %v606_v59, -inf }
  0xd4   :  { %v525_v41 = vrot.slane %v524_v10, 4  ;;  %v616_v63 = vadd.f32 %v582_v58, %v3156_v12  ;;  %v614_v44 = vadd.f32 %v572_v46, %v3161_v13  ;;  %v624_v45 = vsel %vm116_vm1, %v602_v26, -inf }
  0xd5   :  { %v643_v7 = vsel %vm116_vm1, %v609_v42, -inf  ;;  %v621_v28 = vsel %vm116_vm1, %v600_v53, -inf  ;;  %v604_v56 = vadd.f32 %v592_v60, %v3242_v0  ;;  %v507_v39 = vmax.f32 %v505_v35, %v506_v62 }
  0xd6   :  { %v544_v48 = vrot.slane %v543_v2, 4  ;;  %v640_v55 = vsel %vm116_vm1, %v607_v54, -inf  ;;  %v603_v49 = vadd.f32 %v587_v51, %v3170_v18  ;;  %v642_v4 = vmax.f32 %v639_v6, %v3443_v20 }
  0xd7   :  { %v526_v50 = vmax.f32 %v524_v10, %v525_v41  ;;  %v611_v12 = vadd.f32 %v592_v60, %v3247_v34  ;;  %v610_v13 = vadd.f32 %v587_v51, %v3175_v19  ;;  %v658_v58 = vsel %vm116_vm1, %v613_v33, -inf }
  0xd8   :  { %v662_v46 = vsel %vm116_vm1, %v616_v63, -inf  ;;  %v625_v15 = vmax.f32 %v621_v28, %v624_v45  ;;  %v659_v0 = vsel %vm116_vm1, %v614_v44, -inf  ;;  %v644_v5 = vmax.f32 %v640_v55, %v643_v7 }
  0xd9   :  { %v617_v9 = vadd.f32 %v587_v51, %v3185_v24  ;;  %v626_v18 = vsel %vm116_vm1, %v603_v49, -inf  ;;  %v645_v20 = vsel %vm116_vm1, %v610_v13, -inf  ;;  %v508_v25 = vrot.slane %v507_v39, 2 }
  0xda   :  { %v545_v57 = vmax.f32 %v543_v2, %v544_v48  ;;  %v618_v34 = vadd.f32 %v592_v60, %v3255_v40  ;;  %v628_v19 = vsel %vm116_vm1, %v604_v56, -inf  ;;  %v527_v27 = vrot.slane %v526_v50, 2 }
  0xdb   :  { %v647_v59 = vsel %vm116_vm1, %v611_v12, -inf  ;;  %v605_v52 = vadd.f32 %v597_v1, %v3217_v61  ;;  %v612_v22 = vadd.f32 %v597_v1, %v3225_v14  ;;  %v627_v36 = vmax.f32 %v623_v29, %v626_v18 }
  0xdc   :  { %v646_v35 = vmax.f32 %v642_v4, %v645_v20  ;;  %v664_v24 = vsel %vm116_vm1, %v617_v9, -inf  ;;  %v619_v26 = vadd.f32 %v597_v1, %v3235_v23  ;;  %v661_v42 = vmax.f32 %v658_v58, %v3448_v11 }
  0xdd   :  { %v629_v53 = vmax.f32 %v625_v15, %v628_v19  ;;  %v630_v40 = vsel %vm127_vm2, %v605_v52, -inf  ;;  %v649_v10 = vsel %vm127_vm2, %v612_v22, -inf  ;;  %v648_v2 = vmax.f32 %v644_v5, %v647_v59 }
  0xde   :  { %v666_v54 = vsel %vm116_vm1, %v618_v34, -inf  ;;  %v631_v60 = vmax.f32 %v627_v36, %v630_v40  ;;  %v650_v61 = vmax.f32 %v646_v35, %v649_v10  ;;  %v546_v51 = vrot.slane %v545_v57, 2 }
  0xdf   :  { %v663_v14 = vmax.f32 %v659_v0, %v662_v46  ;;  %v665_v33 = vmax.f32 %v661_v42, %v664_v24  ;;  %v668_v29 = vsel %vm127_vm2, %v619_v26, -inf  ;;  %v509_v62 = vmax.f32 %v507_v39, %v508_v25 }
  0xe0   :  { %v528_v6 = vmax.f32 %v526_v50, %v527_v27  ;;  %v632_v23 = vmax.f32 %v631_v60, %v629_v53  ;;  %v651_v41 = vmax.f32 %v650_v61, %v648_v2  ;;  %v3685_v11 = vrot.slane %v3357_v38, 1 }
  0xe1   :  { %v420_v44 = vmax.f32 %v3432_v3, %v419_v21  ;;  %v667_v45 = vmax.f32 %v663_v14, %v666_v54  ;;  %v669_v7 = vmax.f32 %v665_v33, %v668_v29  ;;  %v383_v28 = vrot.slane %v3451_v43, 1 }
  0xe2   :  { %v3501_v63 = vmax.f32 %v3357_v38, %v3685_v11  ;;  %v402_v56 = vrot.slane %v3463_v47, 1  ;;  %v633_v48 = vrot.slane %v632_v23, 4  ;;  %v652_v39 = vrot.slane %v651_v41, 4 }
  0xe3   :  { %v3686_v55 = vrot.slane %v3362_v17, 1  ;;  %v294_v38 = vrot.slane %v3394_v16, 1  ;;  %v547_v4 = vmax.f32 %v545_v57, %v546_v51  ;;  %v670_v50 = vmax.f32 %v669_v7, %v667_v45 }
  0xe4   :  { %v510_v12 = vrot.slane %v509_v62, 1  ;;  %v529_v13 = vrot.slane %v528_v6, 1  ;;  %v634_v3 = vmax.f32 %v632_v23, %v633_v48  ;;  %v653_v21 = vmax.f32 %v651_v41, %v652_v39 }
  0xe5   :  { %v3511_v49 = vmax.f32 %v3362_v17, %v3686_v55  ;;  %v3687_v58 = vrot.slane %v3339_v30, 1  ;;  %v296_v15 = vadd.f32 %v3501_v63, %v3360_v37  ;;  %v421_v0 = vrot.slane %v420_v44, 1 }
  0xe6   :  { %v671_v1 = vrot.slane %v670_v50, 4  ;;  %v3522_v17 = vmax.f32 %v3451_v43, %v383_v28  ;;  %v3525_v5 = vmax.f32 %v3463_v47, %v402_v56  ;;  %v635_v9 = vrot.slane %v634_v3, 2 }
  0xe7   :  { %v3517_v46 = vmax.f32 %v3339_v30, %v3687_v58  ;;  %v654_v18 = vrot.slane %v653_v21, 2  ;;  %v3528_v20 = vmax.f32 %v3394_v16, %v294_v38  ;;  %v548_v25 = vrot.slane %v547_v4, 1 }
  0xe8   :  { %v672_v57 = vmax.f32 %v670_v50, %v671_v1  ;;  %v3532_v34 = vmax.f32 %v509_v62, %v510_v12  ;;  %v3534_v19 = vmax.f32 %v528_v6, %v529_v13  ;;  %v636_v27 = vmax.f32 %v634_v3, %v635_v9 }
  0xe9   :  { %v297_v30 = vadd.f32 %v3511_v49, %v3517_v46  ;;  %v655_v43 = vmax.f32 %v653_v21, %v654_v18  ;;  %v3688_v59 = vrot.slane %v3341_v32, 1  ;;  %v422_v52 = vmax.f32 %v420_v44, %v421_v0 }
  0xea   :  { %v673_v22 = vrot.slane %v672_v57, 2  ;;  %v3541_v16 = vsub.f32 %v3306_v31, %v3321_v8  ;;  %v423_v36 = vadd.f32 %v3522_v17, %v296_v15  ;;  %v637_v24 = vrot.slane %v636_v27, 1 }
  0xeb   :  { %v174_v47 = vmax.f32 %v3341_v32, %v3688_v59  ;;  %v424_v35 = vadd.f32 %v3525_v5, %v297_v30  ;;  %v656_v26 = vrot.slane %v655_v43, 1  ;;  %v549_v53 = vmax.f32 %v547_v4, %v548_v25 }
  0xec   :  { %v674_v40 = vmax.f32 %v672_v57, %v673_v22  ;;  %v550_v10 = vadd.f32 %v3532_v34, %v423_v36  ;;  %v638_v2 = vmax.f32 %v636_v27, %v637_v24  ;;  %v770_v14 = vand.u32 4294901760, %v3541_v16  ;;  %v1615_v36 = vpop.permute.xlu0 %1614 }
  0xed   :  { %v298_v42 = vadd.f32 %v3528_v20, %v174_v47  ;;  %v551_v32 = vadd.f32 %v3534_v19, %v424_v35  ;;  %v657_v54 = vmax.f32 %v655_v43, %v656_v26  ;;  %v3689_v39 = vmov 0.0  }
  0xee   :  { %v675_v61 = vrot.slane %v674_v40, 1  ;;  %v677_v31 = vadd.f32 %v638_v2, %v550_v10  ;;  %v771_v11 = vsub.f32 %v3541_v16, %v770_v14  ;;  %v299_v50 = vmax.f32 %v3360_v37, %v3501_v63  ;;  %v2642_v10 = vld [vmem:[%s3671_s7 + $0x8] sm:$0x7] }
  0xef   :  { %v425_v60 = vadd.f32 %v422_v52, %v298_v42  ;;  %v678_v51 = vadd.f32 %v657_v54, %v551_v32  ;;  %v300_v12 = vmax.f32 %v3517_v46, %v3511_v49  ;;  %v301_v21 = vmax.f32 %v174_v47, %v3528_v20  ;;  %v2641_v42 = vld [vmem:[%s3672_s8 + $0x4] sm:$0x7]  ;;  %v1650_v32 = vld [vmem:[%s3676_s5] sm:$0x7] }
  0xf0   :  { %v676_v33 = vmax.f32 %v674_v40, %v675_v61  ;;  %v683_v62 = vmul.f32 0.2, %v677_v31  ;;  %v772_v28 = vand.u32 4294901760, %v771_v11  ;;  %v426_v13 = vmax.f32 %v299_v50, %v3522_v17  ;;  %v686_v17 = vld [vmem:[%s3675_s3] sm:$0x7]  ;;  %s2902_s3 = smov 1  }
  0xf1   :  { %v552_v29 = vadd.f32 %v549_v53, %v425_v60  ;;  %v684_v6 = vmul.f32 0.2, %v678_v51  ;;  %v427_v3 = vmax.f32 %v300_v12, %v3525_v5  ;;  %v428_v0 = vmax.f32 %v301_v21, %v422_v52  ;;  %v2643_v40 = vld [vmem:[%s3672_s8 + $0x8] sm:$0x7]  ;;  %v2638_v61 = vld [vmem:[%s3677_s2] ss:$0 sm:$0xff] }
  0xf2   :  { %v553_v58 = vmax.f32 %v426_v13, %v3532_v34  ;;  %v1154_v9 = vsel %vm695_vm3, %v686_v17, 0  ;;  %v2901_v24 = vmov 0.0|0.0   ;;  %v2639_v31 = vld [vmem:[%s3677_s2 + $0x1] ss:$0 sm:$0xff] }
  0xf3   :  { %v679_v23 = vadd.f32 %v676_v33, %v552_v29  ;;  %v692_v41 = vsel %vm691_vm4, %v684_v6, %v683_v62  ;;  %v554_v15 = vmax.f32 %v427_v3, %v3534_v19  ;;  %v555_v49 = vmax.f32 %v428_v0, %v549_v53  ;;  %2830 = vmatprep.subr.bf16.mxu1 %v2901_v24  ;;  %v2640_v53 = vld [vmem:[%s3671_s7 + $0x4] sm:$0x7] }
  0xf4   :  { %v680_v37 = vmax.f32 %v553_v58, %v638_v2  ;;  %v1224_v20 = vand.u32 4294901760, %v1154_v9  ;;  %v1653_v2 = vsel %vm1651_vm7, %v1650_v32, 0 }
  0xf5   :  { %v685_v44 = vmul.f32 0.2, %v679_v23  ;;  %v681_v63 = vmax.f32 %v554_v15, %v657_v54  ;;  %v682_v46 = vmax.f32 %v555_v49, %v676_v33  ;;  %v1725_v54 = vand.u32 4294901760, %v1653_v2  ;;  %v2134_v49 = vld [vmem:[%s3678_s6] sm:$0x7] }
  0xf6   :  { %v1225_v25 = vsub.f32 %v1154_v9, %v1224_v20 }
  0xf7   :  { %v694_v45 = vsel %vm693_vm5, %v685_v44, %v692_v41  ;;  %v1151_v1 = vsel %vm691_vm4, %v681_v63, %v680_v37  ;;  %v1726_v60 = vsub.f32 %v1653_v2, %v1725_v54 }
  0xf8   :  { %v700_v7 = vsel %vm699_vm6, %v694_v45, 0  ;;  %v1152_v5 = vsel %vm693_vm5, %v682_v46, %v1151_v1  ;;  %v1226_v34 = vand.u32 4294901760, %v1225_v25  ;;  %v2136_v46 = vsel %vm695_vm3, %v2134_v49, 0 }
  0xf9   :  { %v703_v56 = vand.u32 4294901760, %v700_v7  ;;  %v1156_v18 = vsel %vm699_vm6, %v1152_v5, 0  ;;  %v1727_v41 = vand.u32 4294901760, %v1726_v60  ;;  %v2207_v1 = vand.u32 4294901760, %v2136_v46 }
  0xfa   :  { %v1159_v30 = vand.u32 4294901760, %v1156_v18  ;;  %v1227_v27 = vsub.f32 %v1225_v25, %v1226_v34 }
  0xfb   :  { %2699 = vmatpush3.msra.mxu0 %v703_v56  ;;  %v780_v48 = vsub.f32 %v700_v7, %v703_v56  ;;  %v2208_v17 = vsub.f32 %v2136_v46, %v2207_v1 }
  0xfc   :  { %2701 = vmatmul.mubr.f32.vlgmr.msra.gmra.mrb[0].mxu0 %v772_v28  ;;  %2703 = vmatprep.subr.mxu0 %v3689_v39  ;;  %v1236_v57 = vsub.f32 %v1156_v18, %v1159_v30  ;;  %v1228_v59 = vand.u32 4294901760, %v1227_v27  ;;  %v1728_v28 = vsub.f32 %v1726_v60, %v1727_v41 }
  0xfd   :  { %v781_v55 = vand.u32 4294901760, %v780_v48  ;;  %2705 = vmatprep.mubr.msk.f32.mxu0 %vm2900_vm0, %v3689_v39  ;;  %v2209_v5 = vand.u32 4294901760, %v2208_v17 }
  0xfe   :  { %v1237_v19 = vand.u32 4294901760, %v1236_v57  ;;  %v1729_v50 = vand.u32 4294901760, %v1728_v28 }
  0xff   :  { %v782_v38 = vsub.f32 %v780_v48, %v781_v55 }
 0x100   :  { %v1238_v43 = vsub.f32 %v1236_v57, %v1237_v19 }
 0x101   :  { %v783_v4 = vand.u32 4294901760, %v782_v38 }
 0x102   :  { %v1239_v47 = vand.u32 4294901760, %v1238_v43 }
 0x103   :  { %2704 = vmatpush3.msra.mxu0 %v783_v4 }
 0x104   :  { %2706 = vmatmul.mubr.f32.vlgmr.msra.gmra.mrb[0].mxu0 %v3321_v8  ;;  %2708 = vmatprep.subr.mxu0 %v3689_v39 }
 0x105   :  { %2709 = vmatpush3.msra.mxu0 %v780_v48  ;;  %2710 = vmatprep.mubr.msk.f32.mxu0 %vm2900_vm0, %v3689_v39 }
 0x106   :  { %2713 = vmatprep.subr.mxu0 %v3689_v39 }
 0x10c   :  { %2711 = vmatmul.mubr.f32.vlgmr.msra.gmra.mrb[0].mxu0 %v3541_v16 }
 0x10d   :  { %2714 = vmatpush3.msra.mxu0 %v703_v56  ;;  %2715 = vmatprep.mubr.msk.f32.mxu0 %vm2900_vm0, %v3689_v39 }
 0x10e   :  { %2718 = vmatprep.subr.mxu0 %v3689_v39 }
 0x114   :  { %2716 = vmatmul.mubr.f32.vlgmr.msra.gmra.mrb[0].mxu0 %v770_v14 }
 0x115   :  { %2719 = vmatpush3.msra.mxu0 %v781_v55  ;;  %2720 = vmatprep.mubr.msk.f32.mxu0 %vm2900_vm0, %v3689_v39 }
 0x116   :  { %2723 = vmatprep.subr.mxu0 %v3689_v39 }
 0x11c   :  { %2721 = vmatmul.mubr.f32.vlgmr.msra.gmra.mrb[0].mxu0 %v3321_v8 }
 0x11d   :  { %2724 = vmatpush3.msra.mxu0 %v703_v56  ;;  %2725 = vmatprep.mubr.msk.f32.mxu0 %vm2900_vm0, %v3689_v39 }
 0x11e   :  { %2728 = vmatprep.subr.mxu0 %v3689_v39 }
 0x124   :  { %2726 = vmatmul.mubr.f32.vlgmr.msra.gmra.mrb[0].mxu0 %v3321_v8  ;;  %v1608_v8 = vpop.permute.xlu1 %1607 }
 0x125   :  { %2729 = vmatpush3.msra.mxu0 %v1159_v30  ;;  %2730 = vmatprep.mubr.msk.f32.mxu0 %vm2900_vm0, %v3689_v39 }
 0x126   :  { %2733 = vmatprep.subr.mxu0 %v3689_v39 }
 0x12c   :  { %2731 = vmatmul.mubr.f32.vlgmr.msra.gmra.mrb[0].mxu0 %v1228_v59 }
 0x12d   :  { %2734 = vmatpush3.msra.mxu0 %v1239_v47  ;;  %2735 = vmatprep.mubr.msk.f32.mxu0 %vm2900_vm0, %v3689_v39 }
 0x12e   :  { %2738 = vmatprep.subr.mxu0 %v3689_v39 }
 0x134   :  { %2736 = vmatmul.mubr.f32.vlgmr.msra.gmra.mrb[0].mxu0 %v1224_v20 }
 0x135   :  { %2739 = vmatpush3.msra.mxu0 %v1236_v57  ;;  %2740 = vmatprep.mubr.msk.f32.mxu0 %vm2900_vm0, %v3689_v39 }
 0x136   :  { %2743 = vmatprep.subr.mxu0 %v3689_v39 }
 0x13c   :  { %2741 = vmatmul.mubr.f32.vlgmr.msra.gmra.mrb[0].mxu0 %v1225_v25 }
 0x13d   :  { %2744 = vmatpush3.msra.mxu0 %v1159_v30  ;;  %2745 = vmatprep.mubr.msk.f32.mxu0 %vm2900_vm0, %v3689_v39 }
 0x13e   :  { %2748 = vmatprep.subr.mxu0 %v3689_v39 }
 0x144   :  { %2746 = vmatmul.mubr.f32.vlgmr.msra.gmra.mrb[0].mxu0 %v1226_v34  ;;  %v2210_v34 = vsub.f32 %v2208_v17, %v2209_v5 }
 0x145   :  { %2749 = vmatpush3.msra.mxu0 %v1237_v19  ;;  %2750 = vmatprep.mubr.msk.f32.mxu0 %vm2900_vm0, %v3689_v39 }
 0x146   :  { %2753 = vmatprep.subr.mxu0 %v3689_v39  ;;  %v2211_v43 = vand.u32 4294901760, %v2210_v34 }
 0x14c   :  { %2751 = vmatmul.mubr.f32.vlgmr.msra.gmra.mrb[0].mxu0 %v1224_v20 }
 0x14d   :  { %2754 = vmatpush3.msra.mxu0 %v1159_v30  ;;  %2755 = vmatprep.mubr.msk.f32.mxu0 %vm2900_vm0, %v3689_v39 }
 0x154   :  { %2756 = vmatmul.mubr.f32.vlgmr.msra.gmra.mrb[0].mxu0 %v1224_v20 }
 0x227   :  { %v1600_v52 = vpop.f32.mrb[0].mxu0 }
 0x228   :  { %v1610_v22 = vmul.f32 %v1608_v8, %v1600_v52  ;;  %v2757_v16 = vpop.f32.mrb[1].mxu0 }
 0x22a   :  { %v1617_v35 = vadd.f32 %v1615_v36, %v1610_v22 }
 0x22c   :  { %v1618_v26 = vmax.f32 %v1617_v35, 0.0 }
 0x22e   :  { %1622 = vrot.lane.b32.xlu0 %v1618_v26, %s2902_s3  ;;  %1632 = vrot.lane.b32.xlu1 %v1618_v26, %s2903_s1  ;;  %v1642_v62 = vrot.slane %v1618_v26, 5 }
 0x232   :  { %2129 = vperm.xlu0 %2896, %v2641_v42   ;;  %2121 = vperm.xlu1 %2897, %v2640_v53  }
 0x236   :  { %2599 = vperm.xlu0 %2896, %v2643_v40   ;;  %2591 = vperm.xlu1 %2897, %v2642_v10  }
 0x2a0   :  { %v1623_v51 = vpop.permute.xlu0 %1622  ;;  %v1633_v14 = vpop.permute.xlu1 %1632 }
 0x2a1   :  { %v1626_v33 = vsel %vm1625_vm8, 0.0, %v1623_v51  ;;  %v1636_v29 = vsel %vm1635_vm9, %v1633_v14, 0.0 }
 0x2a2   :  { %v1631_v6 = vmul.f32 %v2638_v61, %v1626_v33  ;;  %v1641_v23 = vmul.f32 %v2639_v31, %v1636_v29 }
 0x2a4   :  { %v1647_v11 = vsel %vm699_vm6, %v1631_v6, %v1642_v62  ;;  %v1645_v44 = vrot.slane %v1641_v23, 2 }
 0x2a6   :  { %v1649_v45 = vsel %vm1648_vm10, %v1647_v11, %v1645_v44  ;;  %v1656_v7 = vsel %vm1655_vm11, %v1645_v44, 0 }
 0x2a7   :  { %v1662_v56 = vand.u32 4294901760, %v1656_v7  ;;  %v1659_v48 = vand.u32 4294901760, %v1649_v45 }
 0x2a9   :  { %v1744_v55 = vsub.f32 %v1656_v7, %v1662_v56  ;;  %v2831_v38 = vpack.c.bf16 %v1662_v56, %v1659_v48  ;;  %v1737_v4 = vsub.f32 %v1649_v45, %v1659_v48 }
 0x2ab   :  { %v1745_v12 = vand.u32 4294901760, %v1744_v55  ;;  %2832 = vmatpush3.bf16.msra.mxu1 %v2831_v38  ;;  %v1738_v13 = vand.u32 4294901760, %v1737_v4  ;;  %v2837_v37 = vpack.c.bf16 %v1744_v55, %v1737_v4 }
 0x2ac   :  { %2833 = vmatprep.subr.bf16.mxu1 %v2901_v24 }
 0x2ad   :  { %v1746_v3 = vsub.f32 %v1744_v55, %v1745_v12  ;;  %v1739_v21 = vsub.f32 %v1737_v4, %v1738_v13  ;;  %v2843_v63 = vpack.c.bf16 %v1745_v12, %v1738_v13 }
 0x2ae   :  { %2763 = vmatmul.mubr.f32.vlgmr.msra.gmra.mrb[0].mxu1 %v1729_v50 }
 0x2af   :  { %v1740_v58 = vand.u32 4294901760, %v1739_v21  ;;  %v1747_v15 = vand.u32 4294901760, %v1746_v3  ;;  %2769 = vmatprep.mubr.msk.f32.mxu1 %vm2900_vm0, %v3689_v39 }
 0x2b1   :  { %v2834_v0 = vpack.c.bf16 %v1747_v15, %v1740_v58  ;;  %v2122_v9 = vpop.permute.xlu1 %2121  ;;  %v2130_v25 = vpop.permute.xlu0 %2129 }
 0x2b3   :  { %2835 = vmatpush3.bf16.msra.mxu1 %v2834_v0 }
 0x2b4   :  { %2836 = vmatprep.subr.bf16.mxu1 %v2901_v24 }
 0x2b5   :  { %v2592_v16 = vpop.permute.xlu1 %2591  ;;  %v2600_v26 = vpop.permute.xlu0 %2599 }
 0x2b6   :  { %2770 = vmatmul.mubr.f32.vlgmr.msra.gmra.mrb[0].mxu1 %v1725_v54 }
 0x2b7   :  { %2838 = vmatpush3.bf16.msra.mxu1 %v2837_v37  ;;  %2776 = vmatprep.mubr.msk.f32.mxu1 %vm2900_vm0, %v3689_v39 }
 0x2b8   :  { %2839 = vmatprep.subr.bf16.mxu1 %v2901_v24 }
 0x2be   :  { %2777 = vmatmul.mubr.f32.vlgmr.msra.gmra.mrb[0].mxu1 %v1726_v60 }
 0x2bf   :  { %2841 = vmatpush3.bf16.msra.mxu1 %v2831_v38  ;;  %2783 = vmatprep.mubr.msk.f32.mxu1 %vm2900_vm0, %v3689_v39 }
 0x2c0   :  { %2842 = vmatprep.subr.bf16.mxu1 %v2901_v24 }
 0x2c6   :  { %2784 = vmatmul.mubr.f32.vlgmr.msra.gmra.mrb[0].mxu1 %v1727_v41 }
 0x2c7   :  { %2844 = vmatpush3.bf16.msra.mxu1 %v2843_v63  ;;  %2790 = vmatprep.mubr.msk.f32.mxu1 %vm2900_vm0, %v3689_v39 }
 0x2c8   :  { %2845 = vmatprep.subr.bf16.mxu1 %v2901_v24 }
 0x2ce   :  { %2791 = vmatmul.mubr.f32.vlgmr.msra.gmra.mrb[0].mxu1 %v1725_v54 }
 0x2cf   :  { %2847 = vmatpush3.bf16.msra.mxu1 %v2831_v38  ;;  %2797 = vmatprep.mubr.msk.f32.mxu1 %vm2900_vm0, %v3689_v39 }
 0x2d0   :  { %2800 = vmatprep.subr.mxu1 %v3689_v39 }
 0x2d6   :  { %2798 = vmatmul.mubr.f32.vlgmr.msra.gmra.mrb[0].mxu1 %v1725_v54 }
 0x2d7   :  { %2802 = vmatprep.mubr.msk.f32.mxu1 %vm2900_vm0, %v3689_v39 }
 0x3a9   :  { %v2113_v18 = vpop.f32.mrb[0].mxu1 }
 0x3aa   :  { %v2124_v20 = vmul.f32 %v2122_v9, %v2113_v18  ;;  %v2799_v30 = vpop.f32.mrb[1].mxu1 }
 0x3ac   :  { %v2132_v57 = vadd.f32 %v2130_v25, %v2124_v20 }
 0x3ae   :  { %v2133_v19 = vmax.f32 %v2132_v57, 0.0 }
 0x3b0   :  { %v2139_v27 = vsel %vm699_vm6, %v2133_v19, 0 }
 0x3b1   :  { %v2142_v59 = vand.u32 4294901760, %v2139_v27 }
 0x3b3   :  { %v2219_v47 = vsub.f32 %v2139_v27, %v2142_v59  ;;  %2801 = vmatpush3.msra.mxu1 %v2142_v59 }
 0x3b4   :  { %2803 = vmatmul.mubr.f32.vlgmr.msra.gmra.mrb[2].mxu1 %v2211_v43  ;;  %2805 = vmatprep.subr.mxu1 %v3689_v39 }
 0x3b5   :  { %v2220_v8 = vand.u32 4294901760, %v2219_v47  ;;  %2807 = vmatprep.mubr.msk.f32.mxu1 %vm2900_vm0, %v3689_v39 }
 0x3b7   :  { %v2221_v52 = vsub.f32 %v2219_v47, %v2220_v8 }
 0x3b9   :  { %v2222_v22 = vand.u32 4294901760, %v2221_v52 }
 0x3bb   :  { %2806 = vmatpush3.msra.mxu1 %v2222_v22 }
 0x3bc   :  { %2808 = vmatmul.mubr.f32.vlgmr.msra.gmra.mrb[2].mxu1 %v2207_v1  ;;  %2810 = vmatprep.subr.mxu1 %v3689_v39 }
 0x3bd   :  { %2811 = vmatpush3.msra.mxu1 %v2219_v47  ;;  %2812 = vmatprep.mubr.msk.f32.mxu1 %vm2900_vm0, %v3689_v39 }
 0x3be   :  { %2815 = vmatprep.subr.mxu1 %v3689_v39 }
 0x3c4   :  { %2813 = vmatmul.mubr.f32.vlgmr.msra.gmra.mrb[2].mxu1 %v2208_v17 }
 0x3c5   :  { %2816 = vmatpush3.msra.mxu1 %v2142_v59  ;;  %2817 = vmatprep.mubr.msk.f32.mxu1 %vm2900_vm0, %v3689_v39 }
 0x3c6   :  { %2820 = vmatprep.subr.mxu1 %v3689_v39 }
 0x3cc   :  { %2818 = vmatmul.mubr.f32.vlgmr.msra.gmra.mrb[2].mxu1 %v2209_v5 }
 0x3cd   :  { %2821 = vmatpush3.msra.mxu1 %v2220_v8  ;;  %2822 = vmatprep.mubr.msk.f32.mxu1 %vm2900_vm0, %v3689_v39 }
 0x3ce   :  { %2825 = vmatprep.subr.mxu1 %v3689_v39 }
 0x3d4   :  { %2823 = vmatmul.mubr.f32.vlgmr.msra.gmra.mrb[2].mxu1 %v2207_v1 }
 0x3d5   :  { %2826 = vmatpush3.msra.mxu1 %v2142_v59  ;;  %2827 = vmatprep.mubr.msk.f32.mxu1 %vm2900_vm0, %v3689_v39 }
 0x3dc   :  { %2828 = vmatmul.mubr.f32.vlgmr.msra.gmra.mrb[2].mxu1 %v2207_v1 }
 0x4af   :  { %v2583_v36 = vpop.f32.mrb[2].mxu1 }
 0x4b0   :  { %v2594_v35 = vmul.f32 %v2592_v16, %v2583_v36  ;;  %v2829_v24 = vpop.f32.mrb[3].mxu1 }
 0x4b2   :  { %v2602_v42 = vadd.f32 %v2600_v26, %v2594_v35 }
 0x4b4   :  { %v2603_v53 = vmax.f32 %v2602_v42, 0.0 }
 0x4b6   :  { %2605 = vst.msk [vmem:[%s3679_s9] sm:$0x7] %vm2604_vm12, %v2603_v53 }

</bundles_post_ra>
